<compile_context>
chip_gen: v6e
topology: v6e:2x2x1
jax: 0.10.0
libtpu: 0.0.40
codegen_flags: <defaults>
</compile_context>

<pallas_src>
import functools

import jax
import jax.numpy as jnp
import numpy as np
from jax import lax
from jax.experimental import pallas as pl
from jax.experimental.pallas import tpu as pltpu


def _bilstm_kernel(lens_ref, xf_ref, xb_ref,
                   wif_ref, wib_ref, bf_ref, bb_ref,
                   whf_ref, whb_ref,
                   wfc_f_ref, wfc_b_ref, bfc_ref,
                   out_ref,
                   hf_ref, cf_ref, hb_ref, cb_ref,
                   *, T, Tc, Bb, E, Hh, mxu_dtype):
    t_blk = pl.program_id(1)
    H4 = 4 * Hh

    # ---- reset carried state at the first time chunk of every batch block ----
    @pl.when(t_blk == 0)
    def _():
        hf_ref[...] = jnp.zeros_like(hf_ref)
        cf_ref[...] = jnp.zeros_like(cf_ref)
        hb_ref[...] = jnp.zeros_like(hb_ref)
        cb_ref[...] = jnp.zeros_like(cb_ref)

    # ---- per-chunk input projection: one MXU matmul per direction, no zero
    # blocks, off the serial chain (overlaps previous chunk via the pipeline).
    # Bb is a multiple of the sublane tile, so the (Tc, Bb, E)->(Tc*Bb, E)
    # collapse is layout-preserving. bf16 operands, f32 accumulation. ----
    xf = xf_ref[...].reshape(Tc * Bb, E).astype(mxu_dtype)
    xb = xb_ref[...].reshape(Tc * Bb, E).astype(mxu_dtype)
    gxf = jnp.dot(xf, wif_ref[...], preferred_element_type=jnp.float32) + bf_ref[...]
    gxb = jnp.dot(xb, wib_ref[...], preferred_element_type=jnp.float32) + bb_ref[...]

    # ---- hoisted constants (masks, activation affine) ----
    lens = lens_ref[...]                                    # (Bb, 1) int32
    lens_h = jnp.broadcast_to(lens, (Bb, Hh))               # fwd updates: s <  len
    rev_start = T - lens_h                                  # bwd updates: s >= T-len
    # sigmoid(x) = 0.5*(1 + tanh(0.5*x)) on i/f/o lanes, plain tanh on g lanes:
    # ONE full-width EUP tanh per gate vector instead of 3 sigmoids + 1 tanh.
    lane = lax.broadcasted_iota(jnp.int32, (1, H4), 1)
    is_g = jnp.logical_and(lane >= 2 * Hh, lane < 3 * Hh)
    scale = jnp.where(is_g, 1.0, 0.5).astype(jnp.float32)   # pre & post scale
    shift = jnp.where(is_g, 0.0, 0.5).astype(jnp.float32)   # post offset

    whf = whf_ref[...]                                      # (Hh, 4Hh) mxu_dtype
    whb = whb_ref[...]

    hf = hf_ref[...]
    cf = cf_ref[...]
    hb = hb_ref[...]
    cb = cb_ref[...]

    # ---- fused fwd+bwd recurrence over this chunk; only one small
    # (Bb,Hh)@(Hh,4Hh) dot per direction sits on the serial chain. Tc is small
    # and static, so a full unroll is fine here.
    # TODO(synk): switch to lax.fori_loop(..., unroll=4..8) if Tc is made large. ----
    for s in range(Tc):
        s_glob = t_blk * Tc + s            # fused step: fwd time s_glob, bwd time T-1-s_glob
        g_f = gxf[s * Bb:(s + 1) * Bb, :] + jnp.dot(
            hf.astype(mxu_dtype), whf, preferred_element_type=jnp.float32)
        g_b = gxb[(Tc - 1 - s) * Bb:(Tc - s) * Bb, :] + jnp.dot(
            hb.astype(mxu_dtype), whb, preferred_element_type=jnp.float32)
        a_f = scale * jnp.tanh(scale * g_f) + shift          # (Bb, 4Hh) f32
        a_b = scale * jnp.tanh(scale * g_b) + shift
        # NOTE: gate slabs become lane-tile aligned once Hh is a multiple of 128.
        i_f, f_f, gg_f, o_f = (a_f[:, :Hh], a_f[:, Hh:2 * Hh],
                               a_f[:, 2 * Hh:3 * Hh], a_f[:, 3 * Hh:])
        i_b, f_b, gg_b, o_b = (a_b[:, :Hh], a_b[:, Hh:2 * Hh],
                               a_b[:, 2 * Hh:3 * Hh], a_b[:, 3 * Hh:])
        cf_new = f_f * cf + i_f * gg_f
        hf_new = o_f * jnp.tanh(cf_new)
        cb_new = f_b * cb + i_b * gg_b
        hb_new = o_b * jnp.tanh(cb_new)
        upd_f = s_glob < lens_h
        upd_b = s_glob >= rev_start
        hf = jnp.where(upd_f, hf_new, hf)
        cf = jnp.where(upd_f, cf_new, cf)
        hb = jnp.where(upd_b, hb_new, hb)
        cb = jnp.where(upd_b, cb_new, cb)

    hf_ref[...] = hf
    cf_ref[...] = cf
    hb_ref[...] = hb
    cb_ref[...] = cb

    # ---- after the last chunk: out = [h_fwd | h_bwd] @ w_fc + b (two dots, no
    # in-kernel concat; O padded to a lane-dense 128 multiple in the wrapper) ----
    @pl.when(t_blk == pl.num_programs(1) - 1)
    def _():
        out_ref[...] = (
            jnp.dot(hf, wfc_f_ref[...], preferred_element_type=jnp.float32)
            + jnp.dot(hb, wfc_b_ref[...], preferred_element_type=jnp.float32)
            + bfc_ref[...])


def rnn_forward(params, x_tokens, seq_lengths, *, t_chunk=8, batch_block=16,
                mxu_dtype=jnp.bfloat16):
    """x_tokens: (B, T) int32 token ids; seq_lengths: (B,) int32."""
    emb = params["embedding"]                       # (V, E), pad row is zero
    B, T = x_tokens.shape
    E = emb.shape[1]
    Hh = params["w_hh_f"].shape[0]
    O = params["b_fc"].shape[-1]

    Tc = int(min(t_chunk, T))
    T_pad = ((T + Tc - 1) // Tc) * Tc
    Bb = int(batch_block)                           # sublane-dense (f32: 8, bf16: 16)
    B_pad = ((B + Bb - 1) // Bb) * Bb
    O_pad = ((O + 127) // 128) * 128                # lane-dense FC output
    nT = T_pad // Tc
    nB = B_pad // Bb

    # Gather the embedding directly into (T, B, E) (no separate transpose pass),
    # pad T/B (padded steps & rows are masked out / length-0), cast to bf16.
    x = jnp.take(emb, x_tokens.T, axis=0)                           # (T, B, E)
    x = jnp.pad(x, ((0, T_pad - T), (0, B_pad - B), (0, 0))).astype(mxu_dtype)
    lens = jnp.pad(seq_lengths.astype(jnp.int32), (0, B_pad - B)).reshape(B_pad, 1)

    wif = params["w_ih_f"].astype(mxu_dtype)                        # (E, 4Hh)
    wib = params["w_ih_b"].astype(mxu_dtype)
    bf = params["b_f"].astype(jnp.float32)                          # (1, 4Hh)
    bb = params["b_b"].astype(jnp.float32)
    whf = params["w_hh_f"].astype(mxu_dtype)                        # (Hh, 4Hh)
    whb = params["w_hh_b"].astype(mxu_dtype)
    wfc = jnp.pad(params["w_fc"].astype(jnp.float32), ((0, 0), (0, O_pad - O)))
    wfc_f, wfc_b = wfc[:Hh, :], wfc[Hh:, :]                         # (Hh, O_pad) each
    bfc = jnp.pad(params["b_fc"].astype(jnp.float32), ((0, 0), (0, O_pad - O)))

    kernel = functools.partial(_bilstm_kernel, T=T_pad, Tc=Tc, Bb=Bb, E=E, Hh=Hh,
                               mxu_dtype=mxu_dtype)
    const = lambda b, t: (0, 0)

    out_pad = pl.pallas_call(
        kernel,
        out_shape=jax.ShapeDtypeStruct((B_pad, O_pad), jnp.float32),
        grid_spec=pltpu.PrefetchScalarGridSpec(
            num_scalar_prefetch=0,
            grid=(nB, nT),                                          # (batch, time-chunk)
            in_specs=[
                pl.BlockSpec((Bb, 1), lambda b, t: (b, 0)),                   # lens
                pl.BlockSpec((Tc, Bb, E), lambda b, t: (t, b, 0)),            # x, fwd chunk
                pl.BlockSpec((Tc, Bb, E), lambda b, t: (nT - 1 - t, b, 0)),   # x, bwd chunk
                pl.BlockSpec((E, 4 * Hh), const),                             # w_ih fwd
                pl.BlockSpec((E, 4 * Hh), const),                             # w_ih bwd
                pl.BlockSpec((1, 4 * Hh), const),                             # bias fwd
                pl.BlockSpec((1, 4 * Hh), const),                             # bias bwd
                pl.BlockSpec((Hh, 4 * Hh), const),                            # w_hh fwd
                pl.BlockSpec((Hh, 4 * Hh), const),                            # w_hh bwd
                pl.BlockSpec((Hh, O_pad), const),                             # w_fc fwd half
                pl.BlockSpec((Hh, O_pad), const),                             # w_fc bwd half
                pl.BlockSpec((1, O_pad), const),                              # b_fc
            ],
            out_specs=pl.BlockSpec((Bb, O_pad), lambda b, t: (b, 0)),
            scratch_shapes=[pltpu.VMEM((Bb, Hh), jnp.float32)] * 4,           # hf, cf, hb, cb
        ),
        compiler_params=pltpu.CompilerParams(
            dimension_semantics=("parallel", "arbitrary")),
    )(lens, x, x, wif, wib, bf, bb, whf, whb, wfc_f, wfc_b, bfc)
    return out_pad[:B, :O]


def init_params(key, output_size, vocab_size, embed_size, hidden_size, pad_idx):
    Hh = hidden_size // 2                           # bidirectional -> half hidden
    k_lstm = 1.0 / np.sqrt(Hh)
    k_fc = 1.0 / np.sqrt(2 * Hh)
    keys = jax.random.split(key, 9)

    def u(k_, shape, scale):
        return jax.random.uniform(k_, shape, jnp.float32, -scale, scale)

    emb = jax.random.normal(keys[0], (vocab_size, embed_size), jnp.float32)
    emb = emb.at[pad_idx].set(0.0)                  # nn.Embedding(padding_idx=...)
    return {
        "embedding": emb,
        "w_ih_f": u(keys[1], (embed_size, 4 * Hh), k_lstm),
        "w_hh_f": u(keys[2], (Hh, 4 * Hh), k_lstm),
        "b_f":    u(keys[3], (1, 4 * Hh), k_lstm),  # b_ih + b_hh combined
        "w_ih_b": u(keys[4], (embed_size, 4 * Hh), k_lstm),
        "w_hh_b": u(keys[5], (Hh, 4 * Hh), k_lstm),
        "b_b":    u(keys[6], (1, 4 * Hh), k_lstm),
        "w_fc":   u(keys[7], (2 * Hh, output_size), k_fc),
        "b_fc":   u(keys[8], (1, output_size), k_fc),
    }


def rnn_forward_ref(params, x_tokens, seq_lengths):
    """Pure-JAX f32 reference of the same math (for correctness check)."""
    seqs = jnp.take(params["embedding"], x_tokens, axis=0)
    B, T, _ = seqs.shape
    Hh = params["w_hh_f"].shape[0]

    def run(wih, whh, b, reverse):
        h = jnp.zeros((B, Hh), jnp.float32)
        c = jnp.zeros((B, Hh), jnp.float32)
        times = range(T - 1, -1, -1) if reverse else range(T)
        for t in times:
            x_t = seqs[:, t, :]
            gates = x_t @ wih + h @ whh + b
            i = jax.nn.sigmoid(gates[:, :Hh])
            f = jax.nn.sigmoid(gates[:, Hh:2 * Hh])
            g = jnp.tanh(gates[:, 2 * Hh:3 * Hh])
            o = jax.nn.sigmoid(gates[:, 3 * Hh:])
            c_new = f * c + i * g
            h_new = o * jnp.tanh(c_new)
            m = (t < seq_lengths.astype(jnp.int32))[:, None]
            h = jnp.where(m, h_new, h)
            c = jnp.where(m, c_new, c)
        return h

    h_f = run(params["w_ih_f"], params["w_hh_f"], params["b_f"], False)
    h_b = run(params["w_ih_b"], params["w_hh_b"], params["b_b"], True)
    hidden = jnp.concatenate([h_f, h_b], axis=1)
    return hidden @ params["w_fc"] + params["b_fc"]


if __name__ == "__main__":
    output_size, vocab_size, embed_size, hidden_size, pad_idx = 8, 32, 32, 32, 0
    B, T = 4, 8

    key = jax.random.PRNGKey(0)
    pkey, xkey = jax.random.split(key)
    params = init_params(pkey, output_size, vocab_size, embed_size, hidden_size, pad_idx)

    # lengths sorted descending, matching pack_padded_sequence(enforce_sorted=True)
    seq_lengths = jnp.array([8, 6, 5, 3], dtype=jnp.int32)
    tokens = jax.random.randint(xkey, (B, T), 1, vocab_size, dtype=jnp.int32)
    t_idx = jnp.arange(T)[None, :]
    tokens = jnp.where(t_idx < seq_lengths[:, None], tokens, pad_idx)

    ref = rnn_forward_ref(params, tokens, seq_lengths)

    # structural check at f32 MXU precision (exercises 2 time chunks + scratch carry)
    out_f32 = jax.block_until_ready(
        rnn_forward(params, tokens, seq_lengths, t_chunk=4, mxu_dtype=jnp.float32))
    assert out_f32.shape == (B, output_size)
    assert np.allclose(np.asarray(out_f32), np.asarray(ref), atol=2e-3, rtol=2e-3), (
        "f32 kernel/reference mismatch")

    # production path: bf16 MXU operands, f32 state/accumulation
    out = jax.block_until_ready(rnn_forward(params, tokens, seq_lengths, t_chunk=4))
    assert out.shape == (B, output_size)
    assert np.allclose(np.asarray(out), np.asarray(ref), atol=5e-2, rtol=5e-2), (
        "bf16 kernel/reference mismatch")
    print("KERNEL_OK")
</pallas_src>

<mosaic_0001>
module attributes {stable_mosaic.version = 11 : i64} {
  func.func @_bilstm_kernel(%arg0: i32, %arg1: i32, %arg2: memref<16x1xi32, #tpu.memory_space<vmem>>, %arg3: memref<4x16x32xf32, #tpu.memory_space<vmem>>, %arg4: memref<4x16x32xf32, #tpu.memory_space<vmem>>, %arg5: memref<32x64xf32, #tpu.memory_space<vmem>>, %arg6: memref<32x64xf32, #tpu.memory_space<vmem>>, %arg7: memref<1x64xf32, #tpu.memory_space<vmem>>, %arg8: memref<1x64xf32, #tpu.memory_space<vmem>>, %arg9: memref<16x64xf32, #tpu.memory_space<vmem>>, %arg10: memref<16x64xf32, #tpu.memory_space<vmem>>, %arg11: memref<16x128xf32, #tpu.memory_space<vmem>>, %arg12: memref<16x128xf32, #tpu.memory_space<vmem>>, %arg13: memref<1x128xf32, #tpu.memory_space<vmem>>, %arg14: memref<16x128xf32, #tpu.memory_space<vmem>>, %arg15: memref<16x16xf32, #tpu.memory_space<vmem>>, %arg16: memref<16x16xf32, #tpu.memory_space<vmem>>, %arg17: memref<16x16xf32, #tpu.memory_space<vmem>>, %arg18: memref<16x16xf32, #tpu.memory_space<vmem>>) attributes {dimension_semantics = [#tpu.dimension_semantics<parallel>, #tpu.dimension_semantics<arbitrary>], iteration_bounds = array<i64: 1, 2>, scalar_prefetch = 0 : i64, scratch_operands = 4 : i64, tpu.core_type = #tpu.core_type<tc>, window_params = [{transform_indices = @transform_0, window_bounds = array<i64: 16, 1>}, {transform_indices = @transform_1, window_bounds = array<i64: 4, 16, 32>}, {transform_indices = @transform_2, window_bounds = array<i64: 4, 16, 32>}, {pipeline_mode = #tpu.pipeline_mode<synchronous>, transform_indices = @transform_3, window_bounds = array<i64: 32, 64>}, {pipeline_mode = #tpu.pipeline_mode<synchronous>, transform_indices = @transform_4, window_bounds = array<i64: 32, 64>}, {pipeline_mode = #tpu.pipeline_mode<synchronous>, transform_indices = @transform_5, window_bounds = array<i64: 1, 64>}, {pipeline_mode = #tpu.pipeline_mode<synchronous>, transform_indices = @transform_6, window_bounds = array<i64: 1, 64>}, {pipeline_mode = #tpu.pipeline_mode<synchronous>, transform_indices = @transform_7, window_bounds = array<i64: 16, 64>}, {pipeline_mode = #tpu.pipeline_mode<synchronous>, transform_indices = @transform_8, window_bounds = array<i64: 16, 64>}, {pipeline_mode = #tpu.pipeline_mode<synchronous>, transform_indices = @transform_9, window_bounds = array<i64: 16, 128>}, {pipeline_mode = #tpu.pipeline_mode<synchronous>, transform_indices = @transform_10, window_bounds = array<i64: 16, 128>}, {pipeline_mode = #tpu.pipeline_mode<synchronous>, transform_indices = @transform_11, window_bounds = array<i64: 1, 128>}, {transform_indices = @transform_12, window_bounds = array<i64: 16, 128>}]} {
    %c0_i32 = arith.constant 0 : i32
    %0 = arith.cmpi eq, %arg1, %c0_i32 : i32
    %1 = arith.extui %0 : i1 to i32
    %c0_i32_0 = arith.constant 0 : i32
    %2 = arith.cmpi ne, %1, %c0_i32_0 : i32
    scf.if %2 {
      %cst_55 = arith.constant 0.000000e+00 : f32
      %239 = vector.broadcast %cst_55 : f32 to vector<16x16xf32>
      %c0_56 = arith.constant 0 : index
      %c0_57 = arith.constant 0 : index
      %240 = vector.load %arg15[%c0_56, %c0_57] : memref<16x16xf32, #tpu.memory_space<vmem>>, vector<16x16xf32>
      tpu.vector_store %arg15[%c0_56, %c0_57], %239 {strides = array<i32>} : memref<16x16xf32, #tpu.memory_space<vmem>>, vector<16x16xf32>,
      %cst_58 = arith.constant 0.000000e+00 : f32
      %241 = vector.broadcast %cst_58 : f32 to vector<16x16xf32>
      %c0_59 = arith.constant 0 : index
      %c0_60 = arith.constant 0 : index
      %242 = vector.load %arg16[%c0_59, %c0_60] : memref<16x16xf32, #tpu.memory_space<vmem>>, vector<16x16xf32>
      tpu.vector_store %arg16[%c0_59, %c0_60], %241 {strides = array<i32>} : memref<16x16xf32, #tpu.memory_space<vmem>>, vector<16x16xf32>,
      %cst_61 = arith.constant 0.000000e+00 : f32
      %243 = vector.broadcast %cst_61 : f32 to vector<16x16xf32>
      %c0_62 = arith.constant 0 : index
      %c0_63 = arith.constant 0 : index
      %244 = vector.load %arg17[%c0_62, %c0_63] : memref<16x16xf32, #tpu.memory_space<vmem>>, vector<16x16xf32>
      tpu.vector_store %arg17[%c0_62, %c0_63], %243 {strides = array<i32>} : memref<16x16xf32, #tpu.memory_space<vmem>>, vector<16x16xf32>,
      %cst_64 = arith.constant 0.000000e+00 : f32
      %245 = vector.broadcast %cst_64 : f32 to vector<16x16xf32>
      %c0_65 = arith.constant 0 : index
      %c0_66 = arith.constant 0 : index
      %246 = vector.load %arg18[%c0_65, %c0_66] : memref<16x16xf32, #tpu.memory_space<vmem>>, vector<16x16xf32>
      tpu.vector_store %arg18[%c0_65, %c0_66], %245 {strides = array<i32>} : memref<16x16xf32, #tpu.memory_space<vmem>>, vector<16x16xf32>,
    } else {
    }
    %c0 = arith.constant 0 : index
    %c0_1 = arith.constant 0 : index
    %c0_2 = arith.constant 0 : index
    %3 = vector.load %arg3[%c0, %c0_1, %c0_2] : memref<4x16x32xf32, #tpu.memory_space<vmem>>, vector<4x16x32xf32>
    %4 = vector.shape_cast %3 : vector<4x16x32xf32> to vector<64x32xf32>
    %c0_3 = arith.constant 0 : index
    %c0_4 = arith.constant 0 : index
    %c0_5 = arith.constant 0 : index
    %5 = vector.load %arg4[%c0_3, %c0_4, %c0_5] : memref<4x16x32xf32, #tpu.memory_space<vmem>>, vector<4x16x32xf32>
    %6 = vector.shape_cast %5 : vector<4x16x32xf32> to vector<64x32xf32>
    %c0_6 = arith.constant 0 : index
    %c0_7 = arith.constant 0 : index
    %7 = vector.load %arg5[%c0_6, %c0_7] : memref<32x64xf32, #tpu.memory_space<vmem>>, vector<32x64xf32>
    %cst = arith.constant dense<0.000000e+00> : vector<64x64xf32>
    %8 = tpu.matmul %4, %7, %cst {dimension_numbers = #tpu.dot_dimension_numbers<[1], [0], [0], [1], [0, 0, 1, 1], [], []>} : vector<64x32xf32>, vector<32x64xf32>, vector<64x64xf32> -> vector<64x64xf32>
    %c0_8 = arith.constant 0 : index
    %c0_9 = arith.constant 0 : index
    %9 = vector.load %arg7[%c0_8, %c0_9] : memref<1x64xf32, #tpu.memory_space<vmem>>, vector<1x64xf32>
    %10 = vector.broadcast %9 : vector<1x64xf32> to vector<64x64xf32>
    %11 = arith.addf %8, %10 : vector<64x64xf32>
    %c0_10 = arith.constant 0 : index
    %c0_11 = arith.constant 0 : index
    %12 = vector.load %arg6[%c0_10, %c0_11] : memref<32x64xf32, #tpu.memory_space<vmem>>, vector<32x64xf32>
    %cst_12 = arith.constant dense<0.000000e+00> : vector<64x64xf32>
    %13 = tpu.matmul %6, %12, %cst_12 {dimension_numbers = #tpu.dot_dimension_numbers<[1], [0], [0], [1], [0, 0, 1, 1], [], []>} : vector<64x32xf32>, vector<32x64xf32>, vector<64x64xf32> -> vector<64x64xf32>
    %c0_13 = arith.constant 0 : index
    %c0_14 = arith.constant 0 : index
    %14 = vector.load %arg8[%c0_13, %c0_14] : memref<1x64xf32, #tpu.memory_space<vmem>>, vector<1x64xf32>
    %15 = vector.broadcast %14 : vector<1x64xf32> to vector<64x64xf32>
    %16 = arith.addf %13, %15 : vector<64x64xf32>
    %c0_15 = arith.constant 0 : index
    %c0_16 = arith.constant 0 : index
    %17 = vector.load %arg2[%c0_15, %c0_16] : memref<16x1xi32, #tpu.memory_space<vmem>>, vector<16x1xi32>
    %18 = vector.shape_cast %17 : vector<16x1xi32> to vector<16x1xi32>
    %19 = vector.broadcast %18 : vector<16x1xi32> to vector<16x16xi32>
    %c8_i32 = arith.constant 8 : i32
    %20 = vector.broadcast %c8_i32 : i32 to vector<16x16xi32>
    %21 = arith.subi %20, %19 : vector<16x16xi32>
    %22 = tpu.iota {dimensions = array<i32: 1>} : vector<1x64xi32>
    %c32_i32 = arith.constant 32 : i32
    %23 = vector.broadcast %c32_i32 : i32 to vector<1x64xi32>
    %24 = arith.cmpi sge, %22, %23 : vector<1x64xi32>
    %c48_i32 = arith.constant 48 : i32
    %25 = vector.broadcast %c48_i32 : i32 to vector<1x64xi32>
    %26 = arith.cmpi slt, %22, %25 : vector<1x64xi32>
    %27 = arith.andi %24, %26 : vector<1x64xi1>
    %cst_17 = arith.constant 1.000000e+00 : f32
    %cst_18 = arith.constant 5.000000e-01 : f32
    %28 = vector.broadcast %cst_17 : f32 to vector<1x64xf32>
    %29 = vector.broadcast %cst_18 : f32 to vector<1x64xf32>
    %30 = arith.select %27, %28, %29 : vector<1x64xi1>, vector<1x64xf32>
    %cst_19 = arith.constant 0.000000e+00 : f32
    %cst_20 = arith.constant 5.000000e-01 : f32
    %31 = vector.broadcast %cst_19 : f32 to vector<1x64xf32>
    %32 = vector.broadcast %cst_20 : f32 to vector<1x64xf32>
    %33 = arith.select %27, %31, %32 : vector<1x64xi1>, vector<1x64xf32>
    %c0_21 = arith.constant 0 : index
    %c0_22 = arith.constant 0 : index
    %34 = vector.load %arg9[%c0_21, %c0_22] : memref<16x64xf32, #tpu.memory_space<vmem>>, vector<16x64xf32>
    %c0_23 = arith.constant 0 : index
    %c0_24 = arith.constant 0 : index
    %35 = vector.load %arg10[%c0_23, %c0_24] : memref<16x64xf32, #tpu.memory_space<vmem>>, vector<16x64xf32>
    %c0_25 = arith.constant 0 : index
    %c0_26 = arith.constant 0 : index
    %36 = vector.load %arg15[%c0_25, %c0_26] : memref<16x16xf32, #tpu.memory_space<vmem>>, vector<16x16xf32>
    %c0_27 = arith.constant 0 : index
    %c0_28 = arith.constant 0 : index
    %37 = vector.load %arg16[%c0_27, %c0_28] : memref<16x16xf32, #tpu.memory_space<vmem>>, vector<16x16xf32>
    %c0_29 = arith.constant 0 : index
    %c0_30 = arith.constant 0 : index
    %38 = vector.load %arg17[%c0_29, %c0_30] : memref<16x16xf32, #tpu.memory_space<vmem>>, vector<16x16xf32>
    %c0_31 = arith.constant 0 : index
    %c0_32 = arith.constant 0 : index
    %39 = vector.load %arg18[%c0_31, %c0_32] : memref<16x16xf32, #tpu.memory_space<vmem>>, vector<16x16xf32>
    %c4_i32 = arith.constant 4 : i32
    %40 = arith.muli %arg1, %c4_i32 : i32
    %c0_i32_33 = arith.constant 0 : i32
    %41 = arith.addi %40, %c0_i32_33 : i32
    %42 = vector.extract_strided_slice %11 {offsets = [0, 0], sizes = [16, 64], strides = [1, 1]} : vector<64x64xf32> to vector<16x64xf32>
    %cst_34 = arith.constant dense<0.000000e+00> : vector<16x64xf32>
    %43 = tpu.matmul %36, %34, %cst_34 {dimension_numbers = #tpu.dot_dimension_numbers<[1], [0], [0], [1], [0, 0, 1, 1], [], []>} : vector<16x16xf32>, vector<16x64xf32>, vector<16x64xf32> -> vector<16x64xf32>
    %44 = arith.addf %42, %43 : vector<16x64xf32>
    %45 = vector.extract_strided_slice %16 {offsets = [48, 0], sizes = [16, 64], strides = [1, 1]} : vector<64x64xf32> to vector<16x64xf32>
    %cst_35 = arith.constant dense<0.000000e+00> : vector<16x64xf32>
    %46 = tpu.matmul %38, %35, %cst_35 {dimension_numbers = #tpu.dot_dimension_numbers<[1], [0], [0], [1], [0, 0, 1, 1], [], []>} : vector<16x16xf32>, vector<16x64xf32>, vector<16x64xf32> -> vector<16x64xf32>
    %47 = arith.addf %45, %46 : vector<16x64xf32>
    %48 = vector.broadcast %30 : vector<1x64xf32> to vector<16x64xf32>
    %49 = arith.mulf %48, %44 : vector<16x64xf32>
    %50 = math.tanh %49 : vector<16x64xf32>
    %51 = vector.broadcast %30 : vector<1x64xf32> to vector<16x64xf32>
    %52 = arith.mulf %51, %50 : vector<16x64xf32>
    %53 = vector.broadcast %33 : vector<1x64xf32> to vector<16x64xf32>
    %54 = arith.addf %52, %53 : vector<16x64xf32>
    %55 = vector.broadcast %30 : vector<1x64xf32> to vector<16x64xf32>
    %56 = arith.mulf %55, %47 : vector<16x64xf32>
    %57 = math.tanh %56 : vector<16x64xf32>
    %58 = vector.broadcast %30 : vector<1x64xf32> to vector<16x64xf32>
    %59 = arith.mulf %58, %57 : vector<16x64xf32>
    %60 = vector.broadcast %33 : vector<1x64xf32> to vector<16x64xf32>
    %61 = arith.addf %59, %60 : vector<16x64xf32>
    %62 = vector.extract_strided_slice %54 {offsets = [0, 0], sizes = [16, 16], strides = [1, 1]} : vector<16x64xf32> to vector<16x16xf32>
    %63 = vector.extract_strided_slice %54 {offsets = [0, 16], sizes = [16, 16], strides = [1, 1]} : vector<16x64xf32> to vector<16x16xf32>
    %64 = vector.extract_strided_slice %54 {offsets = [0, 32], sizes = [16, 16], strides = [1, 1]} : vector<16x64xf32> to vector<16x16xf32>
    %65 = vector.extract_strided_slice %54 {offsets = [0, 48], sizes = [16, 16], strides = [1, 1]} : vector<16x64xf32> to vector<16x16xf32>
    %66 = vector.extract_strided_slice %61 {offsets = [0, 0], sizes = [16, 16], strides = [1, 1]} : vector<16x64xf32> to vector<16x16xf32>
    %67 = vector.extract_strided_slice %61 {offsets = [0, 16], sizes = [16, 16], strides = [1, 1]} : vector<16x64xf32> to vector<16x16xf32>
    %68 = vector.extract_strided_slice %61 {offsets = [0, 32], sizes = [16, 16], strides = [1, 1]} : vector<16x64xf32> to vector<16x16xf32>
    %69 = vector.extract_strided_slice %61 {offsets = [0, 48], sizes = [16, 16], strides = [1, 1]} : vector<16x64xf32> to vector<16x16xf32>
    %70 = arith.mulf %63, %37 : vector<16x16xf32>
    %71 = arith.mulf %62, %64 : vector<16x16xf32>
    %72 = arith.addf %70, %71 : vector<16x16xf32>
    %73 = math.tanh %72 : vector<16x16xf32>
    %74 = arith.mulf %65, %73 : vector<16x16xf32>
    %75 = arith.mulf %67, %39 : vector<16x16xf32>
    %76 = arith.mulf %66, %68 : vector<16x16xf32>
    %77 = arith.addf %75, %76 : vector<16x16xf32>
    %78 = math.tanh %77 : vector<16x16xf32>
    %79 = arith.mulf %69, %78 : vector<16x16xf32>
    %80 = vector.broadcast %41 : i32 to vector<16x16xi32>
    %81 = arith.cmpi slt, %80, %19 : vector<16x16xi32>
    %82 = vector.broadcast %41 : i32 to vector<16x16xi32>
    %83 = arith.cmpi sge, %82, %21 : vector<16x16xi32>
    %84 = arith.select %81, %74, %36 : vector<16x16xi1>, vector<16x16xf32>
    %85 = arith.select %81, %72, %37 : vector<16x16xi1>, vector<16x16xf32>
    %86 = arith.select %83, %79, %38 : vector<16x16xi1>, vector<16x16xf32>
    %87 = arith.select %83, %77, %39 : vector<16x16xi1>, vector<16x16xf32>
    %c4_i32_36 = arith.constant 4 : i32
    %88 = arith.muli %arg1, %c4_i32_36 : i32
    %c1_i32 = arith.constant 1 : i32
    %89 = arith.addi %88, %c1_i32 : i32
    %90 = vector.extract_strided_slice %11 {offsets = [16, 0], sizes = [16, 64], strides = [1, 1]} : vector<64x64xf32> to vector<16x64xf32>
    %cst_37 = arith.constant dense<0.000000e+00> : vector<16x64xf32>
    %91 = tpu.matmul %84, %34, %cst_37 {dimension_numbers = #tpu.dot_dimension_numbers<[1], [0], [0], [1], [0, 0, 1, 1], [], []>} : vector<16x16xf32>, vector<16x64xf32>, vector<16x64xf32> -> vector<16x64xf32>
    %92 = arith.addf %90, %91 : vector<16x64xf32>
    %93 = vector.extract_strided_slice %16 {offsets = [32, 0], sizes = [16, 64], strides = [1, 1]} : vector<64x64xf32> to vector<16x64xf32>
    %cst_38 = arith.constant dense<0.000000e+00> : vector<16x64xf32>
    %94 = tpu.matmul %86, %35, %cst_38 {dimension_numbers = #tpu.dot_dimension_numbers<[1], [0], [0], [1], [0, 0, 1, 1], [], []>} : vector<16x16xf32>, vector<16x64xf32>, vector<16x64xf32> -> vector<16x64xf32>
    %95 = arith.addf %93, %94 : vector<16x64xf32>
    %96 = vector.broadcast %30 : vector<1x64xf32> to vector<16x64xf32>
    %97 = arith.mulf %96, %92 : vector<16x64xf32>
    %98 = math.tanh %97 : vector<16x64xf32>
    %99 = vector.broadcast %30 : vector<1x64xf32> to vector<16x64xf32>
    %100 = arith.mulf %99, %98 : vector<16x64xf32>
    %101 = vector.broadcast %33 : vector<1x64xf32> to vector<16x64xf32>
    %102 = arith.addf %100, %101 : vector<16x64xf32>
    %103 = vector.broadcast %30 : vector<1x64xf32> to vector<16x64xf32>
    %104 = arith.mulf %103, %95 : vector<16x64xf32>
    %105 = math.tanh %104 : vector<16x64xf32>
    %106 = vector.broadcast %30 : vector<1x64xf32> to vector<16x64xf32>
    %107 = arith.mulf %106, %105 : vector<16x64xf32>
    %108 = vector.broadcast %33 : vector<1x64xf32> to vector<16x64xf32>
    %109 = arith.addf %107, %108 : vector<16x64xf32>
    %110 = vector.extract_strided_slice %102 {offsets = [0, 0], sizes = [16, 16], strides = [1, 1]} : vector<16x64xf32> to vector<16x16xf32>
    %111 = vector.extract_strided_slice %102 {offsets = [0, 16], sizes = [16, 16], strides = [1, 1]} : vector<16x64xf32> to vector<16x16xf32>
    %112 = vector.extract_strided_slice %102 {offsets = [0, 32], sizes = [16, 16], strides = [1, 1]} : vector<16x64xf32> to vector<16x16xf32>
    %113 = vector.extract_strided_slice %102 {offsets = [0, 48], sizes = [16, 16], strides = [1, 1]} : vector<16x64xf32> to vector<16x16xf32>
    %114 = vector.extract_strided_slice %109 {offsets = [0, 0], sizes = [16, 16], strides = [1, 1]} : vector<16x64xf32> to vector<16x16xf32>
    %115 = vector.extract_strided_slice %109 {offsets = [0, 16], sizes = [16, 16], strides = [1, 1]} : vector<16x64xf32> to vector<16x16xf32>
    %116 = vector.extract_strided_slice %109 {offsets = [0, 32], sizes = [16, 16], strides = [1, 1]} : vector<16x64xf32> to vector<16x16xf32>
    %117 = vector.extract_strided_slice %109 {offsets = [0, 48], sizes = [16, 16], strides = [1, 1]} : vector<16x64xf32> to vector<16x16xf32>
    %118 = arith.mulf %111, %85 : vector<16x16xf32>
    %119 = arith.mulf %110, %112 : vector<16x16xf32>
    %120 = arith.addf %118, %119 : vector<16x16xf32>
    %121 = math.tanh %120 : vector<16x16xf32>
    %122 = arith.mulf %113, %121 : vector<16x16xf32>
    %123 = arith.mulf %115, %87 : vector<16x16xf32>
    %124 = arith.mulf %114, %116 : vector<16x16xf32>
    %125 = arith.addf %123, %124 : vector<16x16xf32>
    %126 = math.tanh %125 : vector<16x16xf32>
    %127 = arith.mulf %117, %126 : vector<16x16xf32>
    %128 = vector.broadcast %89 : i32 to vector<16x16xi32>
    %129 = arith.cmpi slt, %128, %19 : vector<16x16xi32>
    %130 = vector.broadcast %89 : i32 to vector<16x16xi32>
    %131 = arith.cmpi sge, %130, %21 : vector<16x16xi32>
    %132 = arith.select %129, %122, %84 : vector<16x16xi1>, vector<16x16xf32>
    %133 = arith.select %129, %120, %85 : vector<16x16xi1>, vector<16x16xf32>
    %134 = arith.select %131, %127, %86 : vector<16x16xi1>, vector<16x16xf32>
    %135 = arith.select %131, %125, %87 : vector<16x16xi1>, vector<16x16xf32>
    %c4_i32_39 = arith.constant 4 : i32
    %136 = arith.muli %arg1, %c4_i32_39 : i32
    %c2_i32 = arith.constant 2 : i32
    %137 = arith.addi %136, %c2_i32 : i32
    %138 = vector.extract_strided_slice %11 {offsets = [32, 0], sizes = [16, 64], strides = [1, 1]} : vector<64x64xf32> to vector<16x64xf32>
    %cst_40 = arith.constant dense<0.000000e+00> : vector<16x64xf32>
    %139 = tpu.matmul %132, %34, %cst_40 {dimension_numbers = #tpu.dot_dimension_numbers<[1], [0], [0], [1], [0, 0, 1, 1], [], []>} : vector<16x16xf32>, vector<16x64xf32>, vector<16x64xf32> -> vector<16x64xf32>
    %140 = arith.addf %138, %139 : vector<16x64xf32>
    %141 = vector.extract_strided_slice %16 {offsets = [16, 0], sizes = [16, 64], strides = [1, 1]} : vector<64x64xf32> to vector<16x64xf32>
    %cst_41 = arith.constant dense<0.000000e+00> : vector<16x64xf32>
    %142 = tpu.matmul %134, %35, %cst_41 {dimension_numbers = #tpu.dot_dimension_numbers<[1], [0], [0], [1], [0, 0, 1, 1], [], []>} : vector<16x16xf32>, vector<16x64xf32>, vector<16x64xf32> -> vector<16x64xf32>
    %143 = arith.addf %141, %142 : vector<16x64xf32>
    %144 = vector.broadcast %30 : vector<1x64xf32> to vector<16x64xf32>
    %145 = arith.mulf %144, %140 : vector<16x64xf32>
    %146 = math.tanh %145 : vector<16x64xf32>
    %147 = vector.broadcast %30 : vector<1x64xf32> to vector<16x64xf32>
    %148 = arith.mulf %147, %146 : vector<16x64xf32>
    %149 = vector.broadcast %33 : vector<1x64xf32> to vector<16x64xf32>
    %150 = arith.addf %148, %149 : vector<16x64xf32>
    %151 = vector.broadcast %30 : vector<1x64xf32> to vector<16x64xf32>
    %152 = arith.mulf %151, %143 : vector<16x64xf32>
    %153 = math.tanh %152 : vector<16x64xf32>
    %154 = vector.broadcast %30 : vector<1x64xf32> to vector<16x64xf32>
    %155 = arith.mulf %154, %153 : vector<16x64xf32>
    %156 = vector.broadcast %33 : vector<1x64xf32> to vector<16x64xf32>
    %157 = arith.addf %155, %156 : vector<16x64xf32>
    %158 = vector.extract_strided_slice %150 {offsets = [0, 0], sizes = [16, 16], strides = [1, 1]} : vector<16x64xf32> to vector<16x16xf32>
    %159 = vector.extract_strided_slice %150 {offsets = [0, 16], sizes = [16, 16], strides = [1, 1]} : vector<16x64xf32> to vector<16x16xf32>
    %160 = vector.extract_strided_slice %150 {offsets = [0, 32], sizes = [16, 16], strides = [1, 1]} : vector<16x64xf32> to vector<16x16xf32>
    %161 = vector.extract_strided_slice %150 {offsets = [0, 48], sizes = [16, 16], strides = [1, 1]} : vector<16x64xf32> to vector<16x16xf32>
    %162 = vector.extract_strided_slice %157 {offsets = [0, 0], sizes = [16, 16], strides = [1, 1]} : vector<16x64xf32> to vector<16x16xf32>
    %163 = vector.extract_strided_slice %157 {offsets = [0, 16], sizes = [16, 16], strides = [1, 1]} : vector<16x64xf32> to vector<16x16xf32>
    %164 = vector.extract_strided_slice %157 {offsets = [0, 32], sizes = [16, 16], strides = [1, 1]} : vector<16x64xf32> to vector<16x16xf32>
    %165 = vector.extract_strided_slice %157 {offsets = [0, 48], sizes = [16, 16], strides = [1, 1]} : vector<16x64xf32> to vector<16x16xf32>
    %166 = arith.mulf %159, %133 : vector<16x16xf32>
    %167 = arith.mulf %158, %160 : vector<16x16xf32>
    %168 = arith.addf %166, %167 : vector<16x16xf32>
    %169 = math.tanh %168 : vector<16x16xf32>
    %170 = arith.mulf %161, %169 : vector<16x16xf32>
    %171 = arith.mulf %163, %135 : vector<16x16xf32>
    %172 = arith.mulf %162, %164 : vector<16x16xf32>
    %173 = arith.addf %171, %172 : vector<16x16xf32>
    %174 = math.tanh %173 : vector<16x16xf32>
    %175 = arith.mulf %165, %174 : vector<16x16xf32>
    %176 = vector.broadcast %137 : i32 to vector<16x16xi32>
    %177 = arith.cmpi slt, %176, %19 : vector<16x16xi32>
    %178 = vector.broadcast %137 : i32 to vector<16x16xi32>
    %179 = arith.cmpi sge, %178, %21 : vector<16x16xi32>
    %180 = arith.select %177, %170, %132 : vector<16x16xi1>, vector<16x16xf32>
    %181 = arith.select %177, %168, %133 : vector<16x16xi1>, vector<16x16xf32>
    %182 = arith.select %179, %175, %134 : vector<16x16xi1>, vector<16x16xf32>
    %183 = arith.select %179, %173, %135 : vector<16x16xi1>, vector<16x16xf32>
    %c4_i32_42 = arith.constant 4 : i32
    %184 = arith.muli %arg1, %c4_i32_42 : i32
    %c3_i32 = arith.constant 3 : i32
    %185 = arith.addi %184, %c3_i32 : i32
    %186 = vector.extract_strided_slice %11 {offsets = [48, 0], sizes = [16, 64], strides = [1, 1]} : vector<64x64xf32> to vector<16x64xf32>
    %cst_43 = arith.constant dense<0.000000e+00> : vector<16x64xf32>
    %187 = tpu.matmul %180, %34, %cst_43 {dimension_numbers = #tpu.dot_dimension_numbers<[1], [0], [0], [1], [0, 0, 1, 1], [], []>} : vector<16x16xf32>, vector<16x64xf32>, vector<16x64xf32> -> vector<16x64xf32>
    %188 = arith.addf %186, %187 : vector<16x64xf32>
    %189 = vector.extract_strided_slice %16 {offsets = [0, 0], sizes = [16, 64], strides = [1, 1]} : vector<64x64xf32> to vector<16x64xf32>
    %cst_44 = arith.constant dense<0.000000e+00> : vector<16x64xf32>
    %190 = tpu.matmul %182, %35, %cst_44 {dimension_numbers = #tpu.dot_dimension_numbers<[1], [0], [0], [1], [0, 0, 1, 1], [], []>} : vector<16x16xf32>, vector<16x64xf32>, vector<16x64xf32> -> vector<16x64xf32>
    %191 = arith.addf %189, %190 : vector<16x64xf32>
    %192 = vector.broadcast %30 : vector<1x64xf32> to vector<16x64xf32>
    %193 = arith.mulf %192, %188 : vector<16x64xf32>
    %194 = math.tanh %193 : vector<16x64xf32>
    %195 = vector.broadcast %30 : vector<1x64xf32> to vector<16x64xf32>
    %196 = arith.mulf %195, %194 : vector<16x64xf32>
    %197 = vector.broadcast %33 : vector<1x64xf32> to vector<16x64xf32>
    %198 = arith.addf %196, %197 : vector<16x64xf32>
    %199 = vector.broadcast %30 : vector<1x64xf32> to vector<16x64xf32>
    %200 = arith.mulf %199, %191 : vector<16x64xf32>
    %201 = math.tanh %200 : vector<16x64xf32>
    %202 = vector.broadcast %30 : vector<1x64xf32> to vector<16x64xf32>
    %203 = arith.mulf %202, %201 : vector<16x64xf32>
    %204 = vector.broadcast %33 : vector<1x64xf32> to vector<16x64xf32>
    %205 = arith.addf %203, %204 : vector<16x64xf32>
    %206 = vector.extract_strided_slice %198 {offsets = [0, 0], sizes = [16, 16], strides = [1, 1]} : vector<16x64xf32> to vector<16x16xf32>
    %207 = vector.extract_strided_slice %198 {offsets = [0, 16], sizes = [16, 16], strides = [1, 1]} : vector<16x64xf32> to vector<16x16xf32>
    %208 = vector.extract_strided_slice %198 {offsets = [0, 32], sizes = [16, 16], strides = [1, 1]} : vector<16x64xf32> to vector<16x16xf32>
    %209 = vector.extract_strided_slice %198 {offsets = [0, 48], sizes = [16, 16], strides = [1, 1]} : vector<16x64xf32> to vector<16x16xf32>
    %210 = vector.extract_strided_slice %205 {offsets = [0, 0], sizes = [16, 16], strides = [1, 1]} : vector<16x64xf32> to vector<16x16xf32>
    %211 = vector.extract_strided_slice %205 {offsets = [0, 16], sizes = [16, 16], strides = [1, 1]} : vector<16x64xf32> to vector<16x16xf32>
    %212 = vector.extract_strided_slice %205 {offsets = [0, 32], sizes = [16, 16], strides = [1, 1]} : vector<16x64xf32> to vector<16x16xf32>
    %213 = vector.extract_strided_slice %205 {offsets = [0, 48], sizes = [16, 16], strides = [1, 1]} : vector<16x64xf32> to vector<16x16xf32>
    %214 = arith.mulf %207, %181 : vector<16x16xf32>
    %215 = arith.mulf %206, %208 : vector<16x16xf32>
    %216 = arith.addf %214, %215 : vector<16x16xf32>
    %217 = math.tanh %216 : vector<16x16xf32>
    %218 = arith.mulf %209, %217 : vector<16x16xf32>
    %219 = arith.mulf %211, %183 : vector<16x16xf32>
    %220 = arith.mulf %210, %212 : vector<16x16xf32>
    %221 = arith.addf %219, %220 : vector<16x16xf32>
    %222 = math.tanh %221 : vector<16x16xf32>
    %223 = arith.mulf %213, %222 : vector<16x16xf32>
    %224 = vector.broadcast %185 : i32 to vector<16x16xi32>
    %225 = arith.cmpi slt, %224, %19 : vector<16x16xi32>
    %226 = vector.broadcast %185 : i32 to vector<16x16xi32>
    %227 = arith.cmpi sge, %226, %21 : vector<16x16xi32>
    %228 = arith.select %225, %218, %180 : vector<16x16xi1>, vector<16x16xf32>
    %229 = arith.select %225, %216, %181 : vector<16x16xi1>, vector<16x16xf32>
    %230 = arith.select %227, %223, %182 : vector<16x16xi1>, vector<16x16xf32>
    %231 = arith.select %227, %221, %183 : vector<16x16xi1>, vector<16x16xf32>
    %c0_45 = arith.constant 0 : index
    %c0_46 = arith.constant 0 : index
    %232 = vector.load %arg15[%c0_45, %c0_46] : memref<16x16xf32, #tpu.memory_space<vmem>>, vector<16x16xf32>
    tpu.vector_store %arg15[%c0_45, %c0_46], %228 {strides = array<i32>} : memref<16x16xf32, #tpu.memory_space<vmem>>, vector<16x16xf32>,
    %c0_47 = arith.constant 0 : index
    %c0_48 = arith.constant 0 : index
    %233 = vector.load %arg16[%c0_47, %c0_48] : memref<16x16xf32, #tpu.memory_space<vmem>>, vector<16x16xf32>
    tpu.vector_store %arg16[%c0_47, %c0_48], %229 {strides = array<i32>} : memref<16x16xf32, #tpu.memory_space<vmem>>, vector<16x16xf32>,
    %c0_49 = arith.constant 0 : index
    %c0_50 = arith.constant 0 : index
    %234 = vector.load %arg17[%c0_49, %c0_50] : memref<16x16xf32, #tpu.memory_space<vmem>>, vector<16x16xf32>
    tpu.vector_store %arg17[%c0_49, %c0_50], %230 {strides = array<i32>} : memref<16x16xf32, #tpu.memory_space<vmem>>, vector<16x16xf32>,
    %c0_51 = arith.constant 0 : index
    %c0_52 = arith.constant 0 : index
    %235 = vector.load %arg18[%c0_51, %c0_52] : memref<16x16xf32, #tpu.memory_space<vmem>>, vector<16x16xf32>
    tpu.vector_store %arg18[%c0_51, %c0_52], %231 {strides = array<i32>} : memref<16x16xf32, #tpu.memory_space<vmem>>, vector<16x16xf32>,
    %c1_i32_53 = arith.constant 1 : i32
    %236 = arith.cmpi eq, %arg1, %c1_i32_53 : i32
    %237 = arith.extui %236 : i1 to i32
    %c0_i32_54 = arith.constant 0 : i32
    %238 = arith.cmpi ne, %237, %c0_i32_54 : i32
    scf.if %238 {
      %c0_55 = arith.constant 0 : index
      %c0_56 = arith.constant 0 : index
      %239 = vector.load %arg11[%c0_55, %c0_56] : memref<16x128xf32, #tpu.memory_space<vmem>>, vector<16x128xf32>
      %cst_57 = arith.constant dense<0.000000e+00> : vector<16x128xf32>
      %240 = tpu.matmul %228, %239, %cst_57 {dimension_numbers = #tpu.dot_dimension_numbers<[1], [0], [0], [1], [0, 0, 1, 1], [], []>} : vector<16x16xf32>, vector<16x128xf32>, vector<16x128xf32> -> vector<16x128xf32>
      %c0_58 = arith.constant 0 : index
      %c0_59 = arith.constant 0 : index
      %241 = vector.load %arg12[%c0_58, %c0_59] : memref<16x128xf32, #tpu.memory_space<vmem>>, vector<16x128xf32>
      %cst_60 = arith.constant dense<0.000000e+00> : vector<16x128xf32>
      %242 = tpu.matmul %230, %241, %cst_60 {dimension_numbers = #tpu.dot_dimension_numbers<[1], [0], [0], [1], [0, 0, 1, 1], [], []>} : vector<16x16xf32>, vector<16x128xf32>, vector<16x128xf32> -> vector<16x128xf32>
      %243 = arith.addf %240, %242 : vector<16x128xf32>
      %c0_61 = arith.constant 0 : index
      %c0_62 = arith.constant 0 : index
      %244 = vector.load %arg13[%c0_61, %c0_62] : memref<1x128xf32, #tpu.memory_space<vmem>>, vector<1x128xf32>
      %245 = vector.broadcast %244 : vector<1x128xf32> to vector<16x128xf32>
      %246 = arith.addf %243, %245 : vector<16x128xf32>
      %c0_63 = arith.constant 0 : index
      %c0_64 = arith.constant 0 : index
      %247 = vector.load %arg14[%c0_63, %c0_64] : memref<16x128xf32, #tpu.memory_space<vmem>>, vector<16x128xf32>
      tpu.vector_store %arg14[%c0_63, %c0_64], %246 {strides = array<i32>} : memref<16x128xf32, #tpu.memory_space<vmem>>, vector<16x128xf32>,
    } else {
    }
    return
  }
  func.func @transform_0(%arg0: i32, %arg1: i32) -> (i32, i32) {
    %c0_i32 = arith.constant 0 : i32
    %c0_i32_0 = arith.constant 0 : i32
    return %arg0, %c0_i32 : i32, i32
  }
  func.func @transform_1(%arg0: i32, %arg1: i32) -> (i32, i32, i32) {
    %c0_i32 = arith.constant 0 : i32
    %c0_i32_0 = arith.constant 0 : i32
    return %arg1, %arg0, %c0_i32 : i32, i32, i32
  }
  func.func @transform_2(%arg0: i32, %arg1: i32) -> (i32, i32, i32) {
    %c1_i32 = arith.constant 1 : i32
    %0 = arith.subi %c1_i32, %arg1 : i32
    %c0_i32 = arith.constant 0 : i32
    %c0_i32_0 = arith.constant 0 : i32
    return %0, %arg0, %c0_i32 : i32, i32, i32
  }
  func.func @transform_3(%arg0: i32, %arg1: i32) -> (i32, i32) {
    %c0_i32 = arith.constant 0 : i32
    %c0_i32_0 = arith.constant 0 : i32
    %c0_i32_1 = arith.constant 0 : i32
    return %c0_i32, %c0_i32_0 : i32, i32
  }
  func.func @transform_4(%arg0: i32, %arg1: i32) -> (i32, i32) {
    %c0_i32 = arith.constant 0 : i32
    %c0_i32_0 = arith.constant 0 : i32
    %c0_i32_1 = arith.constant 0 : i32
    return %c0_i32, %c0_i32_0 : i32, i32
  }
  func.func @transform_5(%arg0: i32, %arg1: i32) -> (i32, i32) {
    %c0_i32 = arith.constant 0 : i32
    %c0_i32_0 = arith.constant 0 : i32
    %c0_i32_1 = arith.constant 0 : i32
    return %c0_i32, %c0_i32_0 : i32, i32
  }
  func.func @transform_6(%arg0: i32, %arg1: i32) -> (i32, i32) {
    %c0_i32 = arith.constant 0 : i32
    %c0_i32_0 = arith.constant 0 : i32
    %c0_i32_1 = arith.constant 0 : i32
    return %c0_i32, %c0_i32_0 : i32, i32
  }
  func.func @transform_7(%arg0: i32, %arg1: i32) -> (i32, i32) {
    %c0_i32 = arith.constant 0 : i32
    %c0_i32_0 = arith.constant 0 : i32
    %c0_i32_1 = arith.constant 0 : i32
    return %c0_i32, %c0_i32_0 : i32, i32
  }
  func.func @transform_8(%arg0: i32, %arg1: i32) -> (i32, i32) {
    %c0_i32 = arith.constant 0 : i32
    %c0_i32_0 = arith.constant 0 : i32
    %c0_i32_1 = arith.constant 0 : i32
    return %c0_i32, %c0_i32_0 : i32, i32
  }
  func.func @transform_9(%arg0: i32, %arg1: i32) -> (i32, i32) {
    %c0_i32 = arith.constant 0 : i32
    %c0_i32_0 = arith.constant 0 : i32
    %c0_i32_1 = arith.constant 0 : i32
    return %c0_i32, %c0_i32_0 : i32, i32
  }
  func.func @transform_10(%arg0: i32, %arg1: i32) -> (i32, i32) {
    %c0_i32 = arith.constant 0 : i32
    %c0_i32_0 = arith.constant 0 : i32
    %c0_i32_1 = arith.constant 0 : i32
    return %c0_i32, %c0_i32_0 : i32, i32
  }
  func.func @transform_11(%arg0: i32, %arg1: i32) -> (i32, i32) {
    %c0_i32 = arith.constant 0 : i32
    %c0_i32_0 = arith.constant 0 : i32
    %c0_i32_1 = arith.constant 0 : i32
    return %c0_i32, %c0_i32_0 : i32, i32
  }
  func.func @transform_12(%arg0: i32, %arg1: i32) -> (i32, i32) {
    %c0_i32 = arith.constant 0 : i32
    %c0_i32_0 = arith.constant 0 : i32
    return %arg0, %c0_i32 : i32, i32
  }
}

</mosaic_0001>

<bundles_post_ra>
// kernel: tpu_custom_call.1
= control target key start
LH: loop header
LB: loop body
LE: loop exit
PB: predicated region body
PF: predicated region fallthrough
CT: control target
= control target key end

     0   :  { %s4171_s0 = inlined_call_operand.vmem [shape: s32[16,1], index: 0, kind: input, shape index: {}]   ;;  %s4172_s1 = inlined_call_operand.hbm [shape: f32[8,16,32], index: 1, kind: input, shape index: {}]   ;;  %s4173_s2 = inlined_call_operand.hbm [shape: f32[8,16,32], index: 2, kind: input, shape index: {}]   ;;  %s4174_s3 = inlined_call_operand.hbm [shape: f32[32,64], index: 3, kind: input, shape index: {}]   ;;  %s4175_s4 = inlined_call_operand.hbm [shape: f32[32,64], index: 4, kind: input, shape index: {}]   ;;  %s4176_s5 = inlined_call_operand.vmem [shape: f32[1,64], index: 5, kind: input, shape index: {}]   ;;  %s4177_s6 = inlined_call_operand.hbm [shape: f32[1,64], index: 6, kind: input, shape index: {}]   ;;  %s4178_s7 = inlined_call_operand.vmem [shape: f32[16,64], index: 7, kind: input, shape index: {}]   ;;  %s4179_s8 = inlined_call_operand.hbm [shape: f32[16,64], index: 8, kind: input, shape index: {}]   ;;  %s4180_s9 = inlined_call_operand.vmem [shape: f32[16,128], index: 9, kind: input, shape index: {}]   ;;  %s4181_s10 = inlined_call_operand.hbm [shape: f32[16,128], index: 10, kind: input, shape index: {}]   ;;  %s4182_s11 = inlined_call_operand.vmem [shape: f32[1,128], index: 11, kind: input, shape index: {}]   ;;  %s4183_s12 = inlined_call_operand.hbm [shape: f32[16,128], index: 12, kind: output, shape index: {}]  }
   0x1   :  { %4192 = sst [smem:[#allocation25_spill]] %s4171_s0 }
   0x2   :  { %4193 = sst [smem:[#allocation26_spill]] %s4172_s1 }
   0x3   :  { %4194 = sst [smem:[#allocation27_spill]] %s4174_s3 }
   0x4   :  { %4195 = sst [smem:[#allocation28_spill]] %s4175_s4 }
   0x5   :  { %4196 = sst [smem:[#allocation29_spill]] %s4176_s5 }
   0x6   :  { %4197 = sst [smem:[#allocation30_spill]] %s4177_s6 }
   0x7   :  { %4198 = sst [smem:[#allocation31_spill]] %s4179_s8 }
   0x8   :  { %4199 = sst [smem:[#allocation32_spill]] %s4180_s9 }
   0x9   :  { %4200 = sst [smem:[#allocation33_spill]] %s4181_s10 }
   0xa   :  { %4201 = sst [smem:[#allocation34_spill]] %s4182_s11 }
   0xb   :  { %4202 = sst [smem:[#allocation35_spill]] %s4183_s12 }
   0xc   :  { %17 = vsyncpa [#allocation7], 0 }
   0xd   :  { %19 = vsyncpa [#allocation7 + $0x1], 0 }
   0xe   :  { %20 = vsyncpa [#allocation10], 0 }
   0xf   :  { %22 = vsyncpa [#allocation10 + $0x1], 0 }
  0x10   :  { %23 = vsyncpa [#allocation13], 0 }
  0x11   :  { %24 = vsyncpa [#allocation16], 0 }
  0x12   :  { %25 = vsyncpa [#allocation8], 0  ;;  %s3279_s21 = smov 0   ;;  %s3281_s22 = smov 0  }
  0x13   :  { %s3283_s23 = smov 0   ;;  %s3285_s24 = smov 0  }
  0x14   :  { %s3287_s25 = smov 0   ;;  %s3289_s26 = smov 0  }
  0x15   :  { %s3291_s27 = smov 0   ;;  %s3293_s28 = smov 0  }
  0x16   :  { %s3295_s29 = smov 0  }
  0x17 LB: > { %s3325_s30 = sadd.s32 4294967295, %s3191_s29   ;;  %p2418_p0 = scmp.ge.s32.totalorder %s3191_s29, 1  ;;  %s3191_s29 = sphi %s3295_s29, %s31_s29   ;;  %s3187_s28 = sphi %s3293_s28, %s4242_s28   ;;  %s3183_s27 = sphi %s3291_s27, %s4241_s27   ;;  %s3179_s26 = sphi %s3289_s26, %s4240_s26   ;;  %s3175_s25 = sphi %s3287_s25, %s4239_s25   ;;  %s3171_s24 = sphi %s3285_s24, %s4238_s24   ;;  %s3167_s23 = sphi %s3283_s23, %s4237_s23   ;;  %s3163_s22 = sphi %s3281_s22, %s4236_s22   ;;  %s3159_s21 = sphi %s3279_s21, %s4235_s21  }
  0x18   : > { %p4186_p1 = scmp.eq.s32.totalorder %s3325_s30, 0  ;;  %p347_p2 = scmp.lt.s32.totalorder %s3191_s29, 3 }
  0x19   : > { %s3193_s14 = smov [#allocation11]   ;;  %s3194_s17 = smov [#allocation12]  }
  0x1a   : > { %p3330_p3 = pnand %p2418_p0, %p347_p2  ;;  %s368_s15 = sshll.u32 %s3193_s14, 4  ;;  %s369_s15 = int_to_ptr.vmem [resolvable:$true] %s368_s15 }
  0x1b   : > { %s381_s18 = sshll.u32 %s3194_s17, 4  ;;  %s3195_s19 = smov [#allocation15]   ;;  %s382_s18 = int_to_ptr.vmem [resolvable:$true] %s381_s18 }
  0x1c   : > { %s4203_s13 = scalar_select %p3330_p3, 1, 0 }
  0x1d   : > { %p2694_p4 = pneg %p3330_p3  ;;  %s411_s20 = sshll.u32 %s3195_s19, 4  ;;  %s412_s20 = int_to_ptr.vmem [resolvable:$true] %s411_s20 }
  0x1e   : > { %s2898_s14 = scalar_lea.vmem %s369_s15, 512  ;;  %p2906_p10 = scmp.lt.s32.totalorder %s369_s15, %s369_s15 }
  0x1f   : > { %p3338_p5 = pnand %p2694_p4, %p4186_p1  ;;  %p2899_p7 = scmp.ne.s32.totalorder %s369_s15, %s2898_s14 }
  0x20   : > { %p2907_p11 = scmp.lt.s32.totalorder %s2898_s14, %s2898_s14 }
  0x21   : > { %p3344_p6 = pneg %p3338_p5 }
  0x22   : > { %p2908_p12 = por %p2907_p11, %p2906_p10 }
  0x23   : > { %p2901_p8 = pnand %p2899_p7, %p3344_p6 }
  0x25   : > { %p2902_p9 = pneg %p2901_p8 }
  0x27   : > { %p2909_p13 = pnand %p2908_p12, %p2902_p9 }
  0x29   : > { %2912 = shalt.err (!%p2909_p13)
}
  0x2a   : > { %s4188_s17 = smov 128   ;;  %s4190_s19 = smov 8  }
  0x2b   : > { %s4206_s3 = sld [smem:[#allocation27_spill]]  ;;  %s2924_s0 = scalar_lea.vmem %s382_s18, 512 }
  0x2c   : > { %p2925_p0 = scmp.ne.s32.totalorder %s382_s18, %s2924_s0  ;;  %p2932_p7 = scmp.lt.s32.totalorder %s382_s18, %s382_s18 }
  0x2d   : > { %p2933_p8 = scmp.lt.s32.totalorder %s2924_s0, %s2924_s0 }
  0x2e   : > { %p2927_p2 = pnand %p2925_p0, %p3344_p6 }
  0x2f   : > { %p2934_p9 = por %p2933_p8, %p2932_p7 }
  0x30   : > { %p2928_p4 = pneg %p2927_p2 }
  0x31   : > { %2697 = dma.hbm_to_vmem [thread:$0]  (!%p3338_p5), %s4206_s3, 512, %s369_s15, [#allocation10], %s4188_s17, %s4188_s17, %s4190_s19  }
  0x32   : > { %p2935_p10 = pnand %p2934_p9, %p2928_p4 }
  0x34   : > { %2938 = shalt.err (!%p2935_p10)
}
  0x35   : > { %s4207_s4 = sld [smem:[#allocation28_spill]]  ;;  %s2950_s9 = scalar_lea.vmem %s412_s20, 256 }
  0x36   : > { %p2951_p11 = scmp.ne.s32.totalorder %s412_s20, %s2950_s9  ;;  %p2958_p0 = scmp.lt.s32.totalorder %s412_s20, %s412_s20 }
  0x37   : > { %p2959_p2 = scmp.lt.s32.totalorder %s2950_s9, %s2950_s9 }
  0x38   : > { %p2953_p12 = pnand %p2951_p11, %p3344_p6 }
  0x39   : > { %p2960_p4 = por %p2959_p2, %p2958_p0 }
  0x3a   : > { %p2954_p13 = pneg %p2953_p12 }
  0x3b   : > { %2700 = dma.hbm_to_vmem [thread:$0]  (!%p3338_p5), %s4207_s4, 512, %s382_s18, [#allocation13], %s4188_s17, %s4188_s17, %s4190_s19  }
  0x3c   : > { %p2961_p7 = pnand %p2960_p4, %p2954_p13 }
  0x3e   : > { %2964 = shalt.err (!%p2961_p7)
}
  0x3f   : > { %s4208_s8 = sld [smem:[#allocation31_spill]]  ;;  %s3198_s11 = smov [#allocation14]  }
  0x40   : > { %s398_s15 = sshll.u32 %s3198_s11, 4  ;;  %s3199_s18 = smov [#allocation17]   ;;  %s399_s15 = int_to_ptr.vmem [resolvable:$true] %s398_s15 }
  0x41   : > { %s427_s14 = sshll.u32 %s3199_s18, 4  ;;  %s2976_s3 = scalar_lea.vmem %s399_s15, 16  ;;  %s428_s14 = int_to_ptr.vmem [resolvable:$true] %s427_s14 }
  0x42   : > { %p2977_p8 = scmp.ne.s32.totalorder %s399_s15, %s2976_s3  ;;  %s2983_s9 = scalar_lea.vmem %s399_s15, 32 }
  0x43   : > { %p2984_p11 = scmp.lt.s32.totalorder %s399_s15, %s399_s15  ;;  %p2985_p12 = scmp.lt.s32.totalorder %s2983_s9, %s2976_s3 }
  0x44   : > { %p2979_p9 = pnand %p2977_p8, %p3344_p6 }
  0x45   : > { %2706 = dma.hbm_to_vmem [thread:$0]  (!%p3338_p5), %s4208_s8, 256, %s412_s20, [#allocation16], %s4188_s17, %s4188_s17, %s4190_s19  }
  0x46   : > { %p2980_p10 = pneg %p2979_p9  ;;  %p2986_p13 = por %p2985_p12, %p2984_p11 }
  0x48   : > { %p2987_p0 = pnand %p2986_p13, %p2980_p10 }
  0x4a   : > { %2990 = shalt.err (!%p2987_p0)
}
  0x4b   : > { %s4209_s6 = sld [smem:[#allocation30_spill]]  ;;  %s3002_s5 = scalar_lea.vmem %s428_s14, 256 }
  0x4c   : > { %p3003_p2 = scmp.ne.s32.totalorder %s428_s14, %s3002_s5  ;;  %p3010_p8 = scmp.lt.s32.totalorder %s428_s14, %s428_s14 }
  0x4d   : > { %p3011_p9 = scmp.lt.s32.totalorder %s3002_s5, %s3002_s5 }
  0x4e   : > { %p3005_p4 = pnand %p3003_p2, %p3344_p6 }
  0x4f   : > { %p3012_p1 = por %p3011_p9, %p3010_p8 }
  0x50   : > { %p3006_p7 = pneg %p3005_p4 }
  0x51   : > { %2703 = dma.hbm_to_vmem [thread:$0]  (!%p3338_p5), %s4209_s6, 16, %s399_s15, [#allocation13]  }
  0x52   : > { %p3013_p3 = pnand %p3012_p1, %p3006_p7 }
  0x54   : > { %3016 = shalt.err (!%p3013_p3)
}
  0x55   : > { %s4210_s10 = sld [smem:[#allocation33_spill]]  ;;  %s40_s12 = sadd.s32 1, %s3187_s28 }
  0x56   : > { %p41_p1 = scmp.ge.s32.totalorder %s40_s12, 2  ;;  %s78_s16 = sadd.s32 1, %s3179_s26 }
  0x57   : > { %p85_p3 = scmp.ne.s32.totalorder %s3179_s26, %s3175_s25  ;;  %p86_p6 = scmp.eq.s32.totalorder %s3191_s29, 0 }
  0x58   : > { %s4244_s12 = smov (%p41_p1, %s40_s12), 0  ;;  %p91_p11 = scmp.ne.s32.totalorder %s3175_s25, %s3171_s24 }
  0x59   : > { %p3404_p10 = por %p86_p6, %p85_p3  ;;  %s73_s18 = ssub.s32 %s3187_s28, %s4244_s12 }
  0x5a   : > { %p2722_p12 = scmp.lt.s32.totalorder %s3191_s29, 2  ;;  %p76_p13 = scmp.eq.s32.totalorder %s73_s18, 0 }
  0x5b   : > { %2709 = dma.hbm_to_vmem [thread:$0]  (!%p3338_p5), %s4210_s10, 256, %s428_s14, [#allocation16], %s4188_s17, %s4188_s17, %s4190_s19  }
  0x5c   : > { %p4212_p5 = scmp.eq.s32.totalorder %s3325_s30, 0  ;;  %s444_s9 = sand.u32 1, %s3179_s26  }
  0x5d   : > { %s2489_s0 = sshll.u32 %s3187_s28, 10  ;;  %s2426_s5 = sshll.u32 %s444_s9, 6 }
  0x5e   : > { %p3415_p0 = por %p4212_p5, %p91_p11  ;;  %s4214_s1 = sld [smem:[#allocation26_spill]] }
  0x5f   : > { %s3422_s20 = scalar_select %p76_p13, %s3179_s26, %s78_s16  }
  0x60   : > { %s448_s19 = scalar_lea.vmem [#allocation6], %s2426_s5  ;;  %p3431_p2 = pnand %p2722_p12, %p3404_p10 }
  0x61   : > { %s458_s4 = sshll.u32 %s448_s19, 4  ;;  %s445_s18 = scalar_lea.sflag [#allocation7], %s444_s9  ;;  %s459_s4 = int_to_ptr.vmem [resolvable:$true] %s458_s4 }
  0x62   : > { %p3019_p4 = pneg %p3431_p2  ;;  %s3030_s16 = scalar_lea.vmem %s459_s4, 1024 }
  0x63   : > { %p3031_p7 = scmp.ne.s32.totalorder %s459_s4, %s3030_s16  ;;  %s3200_s6 = smov [#allocation6]  }
  0x64   : > { %s457_s17 = scalar_lea.hbm %s4214_s1, %s2489_s0  ;;  %s3035_s3 = sshll.u32 %s3200_s6, 4  ;;  %s3036_s3 = int_to_ptr.vmem [resolvable:$false] %s3035_s3 }
  0x65   : > { %p3033_p8 = pnand %p3031_p7, %p3019_p4  ;;  %s3037_s0 = scalar_lea.vmem %s3036_s3, 2048 }
  0x66   : > { %p3038_p1 = scmp.lt.s32.totalorder %s459_s4, %s3036_s3  ;;  %p3039_p3 = scmp.lt.s32.totalorder %s3037_s0, %s3030_s16 }
  0x67   : > { %p3034_p9 = pneg %p3033_p8 }
  0x68   : > { %p3040_p11 = por %p3039_p3, %p3038_p1 }
  0x6a   : > { %p3041_p10 = pnand %p3040_p11, %p3034_p9 }
  0x6c   : > { %3044 = shalt.err (!%p3041_p10)
}
  0x6d   : > { %s4216_s19 = smov 8   ;;  %s4217_s15 = smov 128  }
  0x6e   : > { %2713 = dma.hbm_to_vmem [thread:$0]  (!%p3431_p2), %s457_s17, 1024, %s459_s4, %s445_s18, %s4217_s15, %s4217_s15, %s4216_s19  }
  0x6f   : > { %s101_s6 = ssub.s32 1, %s3187_s28  ;;  %s102_s9 = ssub.s32 1, %s4244_s12 }
  0x70   : > { %s103_s5 = ssub.s32 %s101_s6, %s102_s9  ;;  %s108_s11 = sadd.s32 1, %s3167_s23 }
  0x71   : > { %p106_p13 = scmp.eq.s32.totalorder %s103_s5, 0  ;;  %p115_p5 = scmp.ne.s32.totalorder %s3167_s23, %s3163_s22 }
  0x72   : > { %p121_p4 = scmp.ne.s32.totalorder %s3163_s22, %s3159_s21  ;;  %s468_s24 = sand.u32 1, %s3191_s29  }
  0x73   : > { %s3451_s16 = scalar_select %p106_p13, %s3167_s23, %s108_s11  }
  0x74   : > { %p117_p7 = por %p115_p5, %p86_p6  ;;  %p4218_p8 = scmp.eq.s32.totalorder %s3325_s30, 0 }
  0x75   : > { %s470_s0 = sand.u32 1, %s3167_s23   ;;  %s2491_s17 = sshll.u32 %s101_s6, 10 }
  0x76   : > { %p3457_p9 = por %p121_p4, %p4218_p8  ;;  %s2430_s4 = sshll.u32 %s470_s0, 6 }
  0x77   : > { %s482_s9 = scalar_lea.hbm %s4173_s2, %s2491_s17  ;;  %s472_s5 = scalar_lea.vmem [#allocation9], %s2430_s4 }
  0x78   : > { %s483_s8 = sshll.u32 %s472_s5, 4  ;;  %p3467_p2 = pnand %p2722_p12, %p117_p7  ;;  %s484_s8 = int_to_ptr.vmem [resolvable:$true] %s483_s8 }
  0x79   : > { %s469_s11 = scalar_lea.sflag [#allocation10], %s468_s24  ;;  %s3058_s10 = scalar_lea.vmem %s484_s8, 1024 }
  0x7a   : > { %p3047_p6 = pneg %p3467_p2  ;;  %p3059_p1 = scmp.ne.s32.totalorder %s484_s8, %s3058_s10 }
  0x7b   : > { %s3201_s6 = smov [#allocation9]  }
  0x7c   : > { %p3061_p3 = pnand %p3059_p1, %p3047_p6  ;;  %s3063_s0 = sshll.u32 %s3201_s6, 4  ;;  %s3064_s0 = int_to_ptr.vmem [resolvable:$false] %s3063_s0 }
  0x7d   : > { %s3065_s1 = scalar_lea.vmem %s3064_s0, 2048  ;;  %p3066_p10 = scmp.lt.s32.totalorder %s484_s8, %s3064_s0 }
  0x7e   : > { %p3062_p11 = pneg %p3061_p3  ;;  %p3067_p13 = scmp.lt.s32.totalorder %s3065_s1, %s3058_s10 }
  0x80   : > { %p3068_p5 = por %p3067_p13, %p3066_p10 }
  0x82   : > { %p3069_p12 = pnand %p3068_p5, %p3062_p11 }
  0x84   : > { %3072 = shalt.err (!%p3069_p12)
}
  0x85   : > { %2716 = dma.hbm_to_vmem [thread:$0]  (!%p3467_p2), %s482_s9, 1024, %s484_s8, %s469_s11, %s4217_s15, %s4217_s15, %s4216_s19  }
  0x86   : > { %p4221_p4 = scmp.ne.s32.totalorder %s4203_s13, 0 }
  0x87   : > { %s497_s24 = sand.u32 (!%p4221_p4), 1, %s3175_s25  }
  0x88   : > { %495 = sbr.rel (%p4221_p4) target bundleno = 3243 (0xcab), region = 68  ;;  %s2435_s4 = sshll.u32 (!%p4221_p4), %s497_s24, 6 }
  0x89   : > { %s498_s17 = scalar_lea.sflag (!%p4221_p4), [#allocation7], %s497_s24  ;;  %s3481_s18 = scalar_lea.vmem (!%p4221_p4), [#allocation6], %s2435_s4 }
  0x8d   : > { %3134 = dma.done.wait (%p3415_p0), %s498_s17, 1024  }
  0x8e   : > { %3136 = vsyncadd (%p3415_p0), %s498_s17, 4294966272  ;;  %s506_s10 = sand.u32 1, %s3325_s30   ;;  %s508_s8 = sand.u32 1, %s3163_s22  }
  0x8f   : > { %s2436_s19 = sshll.u32 %s508_s8, 6  ;;  %s507_s13 = scalar_lea.sflag [#allocation10], %s506_s10 }
  0x90   : > { %s3489_s15 = scalar_lea.vmem [#allocation9], %s2436_s19 }
  0x91   : > { %3138 = dma.done.wait (%p3457_p9), %s507_s13, 1024  }
  0x92   : > { %3140 = vsyncadd (%p3457_p9), %s507_s13, 4294966272  ;;  %p4222_p7 = scmp.eq.s32.totalorder %s3325_s30, 0 }
  0x94   : > { %3142 = dma.done.wait (%p4222_p7), [#allocation10], 512   ;;  %p4223_p8 = pmov %p4222_p7 }
  0x95   : > { %p4224_p0 = pmov %p4222_p7 }
  0x96   : > { %3144 = vsyncadd (%p4223_p8), [#allocation10], 4294966784 }
  0x97   : > { %3146 = dma.done.wait (%p4224_p0), [#allocation13], 528   ;;  %p4225_p2 = pmov %p4224_p0 }
  0x98   : > { %p4226_p6 = pmov %p4224_p0 }
  0x99   : > { %3148 = vsyncadd (%p4225_p2), [#allocation13], 4294966768 }
  0x9a   : > { %3150 = dma.done.wait (%p4226_p6), [#allocation16], 512   ;;  %p4227_p1 = pmov %p4224_p0 }
  0x9b   : > { %p2442_p9 = scmp.ne.s32.totalorder %s3183_s27, 0 }
  0x9c   : > { %3152 = vsyncadd (%p4227_p1), [#allocation16], 4294966784 }
  0x9d   : > { %591 = sbr.rel (%p2442_p9) target bundleno = 167 (0xa7), region = 100 }
  0xa2   : > { %vm592_vm0 = vcmask 130048   ;;  %v3202_v0 = vmov 0.0  }
  0xa3   : > { %593 = vst.msk [vmem:[#allocation2] sm:$0xff] %vm592_vm0, %v3202_v0  ;;  %594 = vst.msk [vmem:[#allocation2 + $0x8] sm:$0xff] %vm592_vm0, %v3202_v0 }
  0xa4   : > { %595 = vst.msk [vmem:[#allocation3] sm:$0xff] %vm592_vm0, %v3202_v0  ;;  %596 = vst.msk [vmem:[#allocation3 + $0x8] sm:$0xff] %vm592_vm0, %v3202_v0 }
  0xa5   : > { %597 = vst.msk [vmem:[#allocation4] sm:$0xff] %vm592_vm0, %v3202_v0  ;;  %598 = vst.msk [vmem:[#allocation4 + $0x8] sm:$0xff] %vm592_vm0, %v3202_v0 }
  0xa6   : > { %599 = vst.msk [vmem:[#allocation5] sm:$0xff] %vm592_vm0, %v3202_v0  ;;  %600 = vst.msk [vmem:[#allocation5 + $0x8] sm:$0xff] %vm592_vm0, %v3202_v0 }
  0xa7 PF: > { %v620_v1 = vld [vmem:[#allocation11 + $0x18] sm:$0xff]  ;;  %v619_v3 = vld [vmem:[#allocation11 + $0x10] sm:$0xff]  ;;  %v618_v5 = vld [vmem:[#allocation11 + $0x8] sm:$0xff]  ;;  %vm628_vm1 = vcmask 261120   ;;  %vm928_vm2 = vcmask 130048   ;;  %v908_v37 = vlaneseq  ;;  %s4228_s6 = sld [smem:[#allocation29_spill]] }
  0xa8   : > { %v761_v2 = vld [vmem:[#allocation12 + $0x18] sm:$0xff]  ;;  %2556 = vmatprep.subr.mxu0 %v620_v1  ;;  %v760_v4 = vld [vmem:[#allocation12 + $0x10] sm:$0xff]  ;;  %v759_v6 = vld [vmem:[#allocation12 + $0x8] sm:$0xff]  ;;  %s3205_s0 = smov 96   ;;  %s3206_s1 = smov 16  }
  0xa9   : > { %2576 = vmatprep.subr.mxu1 %v761_v2  ;;  %2557 = vmatpush3.msra.mxu0 %v620_v1  ;;  %v617_v7 = vld [vmem:[#allocation11] sm:$0xff]  ;;  %v602_v10 = vld [vmem:[%s3481_s18 + $0x8] sm:$0xff]  ;;  %v603_v14 = vld [vmem:[%s3481_s18 + $0x10] sm:$0xff]  ;;  %v909_v46 = vand.u32 127, %v908_v37  ;;  %v3204_v37 = vmov 0   ;;  %s4231_s17 = sld [smem:[#allocation25_spill]] }
  0xaa   : > { %2577 = vmatpush3.msra.mxu1 %v761_v2  ;;  %2558 = vmatprep.subr.mxu0 %v619_v3  ;;  %v601_v8 = vld [vmem:[%s3481_s18] sm:$0xff]  ;;  %v3515_v12 = vld [vmem:[%s4178_s7 + $0x8] sm:$0xff]  ;;  %v611_v15 = vld [vmem:[%s3489_s15 + $0x10] sm:$0xff]  ;;  %s3207_s8 = smov 48   ;;  %s3706_s19 = sshll.u32 %s3183_s27, 2 }
  0xab   : > { %2578 = vmatprep.subr.mxu1 %v760_v4  ;;  %2559 = vmatpush3.msra.mxu0 %v619_v3  ;;  %v758_v9 = vld [vmem:[#allocation12] sm:$0xff]  ;;  %v610_v13 = vld [vmem:[%s3489_s15 + $0x8] sm:$0xff]  ;;  %v604_v16 = vld [vmem:[%s3481_s18 + $0x18] sm:$0xff]  ;;  %vm910_vm3 = vcmp.ge.s32.totalorder %v909_v46, 32  ;;  %vm911_vm4 = vcmp.lt.s32.totalorder %v909_v46, 48  ;;  %s1764_s13 = sadd.s32 3, %s3706_s19 }
  0xac   : > { %2579 = vmatpush3.msra.mxu1 %v760_v4  ;;  %2560 = vmatprep.subr.mxu0 %v618_v5  ;;  %v609_v11 = vld [vmem:[%s3489_s15] sm:$0xff]  ;;  %v3524_v17 = vld [vmem:[#allocation15 + $0x8] sm:$0xff]  ;;  %v612_v19 = vld [vmem:[%s3489_s15 + $0x18] sm:$0xff]  ;;  %v3203_v4 = vmov 0.5   ;;  %s3209_s14 = smov 80   ;;  %s1220_s3 = sadd.s32 1, %s3706_s19 }
  0xad   : > { %2580 = vmatprep.subr.mxu1 %v759_v6  ;;  %2561 = vmatpush3.msra.mxu0 %v618_v5  ;;  %v605_v18 = vld [vmem:[%s3481_s18 + $0x20] sm:$0xff]  ;;  %v606_v22 = vld [vmem:[%s3481_s18 + $0x28] sm:$0xff]  ;;  %v607_v24 = vld [vmem:[%s3481_s18 + $0x30] sm:$0xff]  ;;  %s1492_s9 = sadd.s32 2, %s3706_s19  ;;  %s3210_s5 = smov 112  }
  0xae   : > { %2581 = vmatpush3.msra.mxu1 %v759_v6  ;;  %2562 = vmatprep.subr.mxu0 %v617_v7  ;;  %v3535_v20 = vld [vmem:[%s4178_s7] sm:$0xff]  ;;  %v614_v25 = vld [vmem:[%s3489_s15 + $0x28] sm:$0xff]  ;;  %v615_v26 = vld [vmem:[%s3489_s15 + $0x30] sm:$0xff]  ;;  %p2478_p3 = scmp.ne.s32.totalorder %s3183_s27, 1 }
  0xaf   : > { %2564 = vmatprep.mubr.msk.f32.mxu0 %vm628_vm1, %v601_v8  ;;  %2563 = vmatpush3.msra.mxu0 %v617_v7  ;;  %v613_v21 = vld [vmem:[%s3489_s15 + $0x20] sm:$0xff]  ;;  %v608_v27 = vld [vmem:[%s3481_s18 + $0x38] sm:$0xff]  ;;  %v3569_v31 = vld [vmem:[#allocation2 + $0x8] sm:$0xff]  ;;  %s4233_s4 = sld [smem:[#allocation34_spill]] (!%p2478_p3) }
  0xb0   : > { %2582 = vmatprep.subr.mxu1 %v758_v9  ;;  %2565 = vmatmul.mubr.msk.f32.vlgmr.msra.gmra.mxu0 %vm628_vm1, %v602_v10  ;;  %v3543_v23 = vld [vmem:[#allocation15] sm:$0xff]  ;;  %v616_v29 = vld [vmem:[%s3489_s15 + $0x38] sm:$0xff]  ;;  %v2452_v34 = vld [vmem:[#allocation14] ss:$0 sm:$0xff]  ;;  %s3208_s15 = smov 32  }
  0xb1   : > { %2583 = vmatpush3.msra.mxu1 %v758_v9  ;;  %2584 = vmatprep.mubr.msk.f32.mxu1 %vm628_vm1, %v609_v11  ;;  %v3558_v28 = vld [vmem:[#allocation2] sm:$0xff]  ;;  %v3574_v32 = vld [vmem:[#allocation4 + $0x8] sm:$0xff]  ;;  %vm3613_vm5 = vmand %vm910_vm3, %vm911_vm4 }
  0xb2   : > { %2596 = vmatprep.subr.mxu0 %v3515_v12  ;;  %2585 = vmatmul.mubr.msk.f32.vlgmr.msra.gmra.mxu1 %vm628_vm1, %v610_v13  ;;  %v3565_v30 = vld [vmem:[#allocation4] sm:$0xff]  ;;  %v3621_v5 = vsel %vm3613_vm5, 1.0, %v3203_v4  ;;  %v921_v46 = vld [vmem:[#allocation3] sm:$0xff] }
  0xb3   : > { %2597 = vmatpush3.msra.mxu0 %v3515_v12  ;;  %2567 = vmatprep.mubr.msk.f32.mxu0 %vm628_vm1, %v603_v14  ;;  %v2443_v39 = vld [vmem:[%s4228_s6] ss:$0 sm:$0xff]  ;;  %s4232_s6 = sld [smem:[#allocation32_spill]] (!%p2478_p3) }
  0xb4   : > { %2587 = vmatprep.mubr.msk.f32.mxu1 %vm628_vm1, %v611_v15  ;;  %2568 = vmatmul.mubr.msk.f32.gmra.mxu0 %vm628_vm1, %v604_v16 }
  0xb5   : > { %2603 = vmatprep.subr.mxu1 %v3524_v17  ;;  %2570 = vmatprep.mubr.msk.f32.mxu0 %vm628_vm1, %v605_v18 }
  0xb6   : > { %2604 = vmatpush3.msra.mxu1 %v3524_v17  ;;  %2598 = vmatprep.subr.mxu0 %v3535_v20 }
  0xb7   : > { %2588 = vmatmul.mubr.msk.f32.gmra.mxu1 %vm628_vm1, %v612_v19  ;;  %2599 = vmatpush3.msra.mxu0 %v3535_v20 }
  0xb8   : > { %2590 = vmatprep.mubr.msk.f32.mxu1 %vm628_vm1, %v613_v21  ;;  %2571 = vmatmul.mubr.msk.f32.gmra.mxu0 %vm628_vm1, %v606_v22 }
  0xb9   : > { %2605 = vmatprep.subr.mxu1 %v3543_v23  ;;  %2573 = vmatprep.mubr.msk.f32.mxu0 %vm628_vm1, %v607_v24 }
  0xba   : > { %2606 = vmatpush3.msra.mxu1 %v3543_v23  ;;  %2610 = vmatprep.subr.mxu0 %v3515_v12 }
  0xbb   : > { %2591 = vmatmul.mubr.msk.f32.gmra.mxu1 %vm628_vm1, %v614_v25  ;;  %2617 = vmatprep.subr.mxu1 %v3524_v17  ;;  %v3629_v25 = vsel %vm3613_vm5, 0.0, %v3203_v4 }
  0xbc   : > { %2593 = vmatprep.mubr.msk.f32.mxu1 %vm628_vm1, %v615_v26  ;;  %2574 = vmatmul.mubr.msk.f32.gmra.mxu0 %vm628_vm1, %v608_v27 }
  0xbd   : > { %2600 = vmatprep.mubr.msk.f32.mxu0 %vm928_vm2, %v3558_v28  ;;  %2821 = vset.pattern.permute.xlu0 %v3204_v37 }
  0xbe   : > { %2822 = vset.pattern.permute.xlu1 %v3204_v37 }
  0xbf   : > { %2594 = vmatmul.mubr.msk.f32.gmra.mxu1 %vm628_vm1, %v616_v29 }
  0xc0   : > { %2607 = vmatprep.mubr.msk.f32.mxu1 %vm928_vm2, %v3565_v30  ;;  %2601 = vmatmul.mubr.msk.f32.vlgmr.msra.gmra.mxu0 %vm928_vm2, %v3569_v31 }
  0xc1   : > { %2611 = vmatpush3.msra.mxu0 %v3515_v12 }
  0xc2   : > { %2612 = vmatprep.subr.mxu0 %v3535_v20 }
  0xc3   : > { %2608 = vmatmul.mubr.msk.f32.vlgmr.msra.gmra.mxu1 %vm928_vm2, %v3574_v32  ;;  %2613 = vmatpush3.msra.mxu0 %v3535_v20 }
  0xc4   : > { %2618 = vmatpush3.msra.mxu1 %v3524_v17  ;;  %2624 = vmatprep.subr.mxu0 %v3515_v12 }
  0xc5   : > { %2619 = vmatprep.subr.mxu1 %v3543_v23 }
  0xc6   : > { %2620 = vmatpush3.msra.mxu1 %v3543_v23 }
  0xc7   : > { %2631 = vmatprep.subr.mxu1 %v3524_v17 }
 0x170   : > { %v2566_v33 = vpop.f32.mrf.mxu0 }
 0x171   : > { %v725_v0 = vadd.f32 %v2566_v33, %v2443_v39 }
 0x172   : > { %v2586_v35 = vpop.f32.mrf.mxu1  ;;  %v719_v36 = vpop.f32.mrf.mxu0 }
 0x173   : > { %v3588_v38 = vadd.f32 %v2586_v35, %v2452_v34  ;;  %v720_v7 = vadd.f32 %v2443_v39, %v719_v36 }
 0x174   : > { %v859_v40 = vpop.f32.mrf.mxu1  ;;  %v2569_v41 = vpop.f32.mrf.mxu0 }
 0x175   : > { %v3593_v42 = vadd.f32 %v2452_v34, %v859_v40  ;;  %v3595_v43 = vadd.f32 %v2569_v41, %v2443_v39 }
 0x176   : > { %v729_v45 = vpop.f32.mrf.mxu0 }
 0x177   : > { %v2589_v44 = vpop.f32.mrf.mxu1  ;;  %v3599_v48 = vadd.f32 %v2443_v39, %v729_v45  ;;  %v925_v45 = vld [vmem:[#allocation5] sm:$0xff] }
 0x178   : > { %v3597_v47 = vadd.f32 %v2589_v44, %v2452_v34  ;;  %v2572_v50 = vpop.f32.mrf.mxu0 }
 0x179   : > { %v869_v49 = vpop.f32.mrf.mxu1  ;;  %v3603_v52 = vadd.f32 %v2572_v50, %v2443_v39  ;;  %v922_v50 = vld [vmem:[#allocation3 + $0x8] sm:$0xff] }
 0x17a   : > { %v3601_v51 = vadd.f32 %v2452_v34, %v869_v49  ;;  %v739_v54 = vpop.f32.mrf.mxu0  ;;  %v926_v49 = vld [vmem:[#allocation5 + $0x8] sm:$0xff] }
 0x17b   : > { %v2592_v53 = vpop.f32.mrf.mxu1  ;;  %v3607_v56 = vadd.f32 %v2443_v39, %v739_v54 }
 0x17c   : > { %v3605_v55 = vadd.f32 %v2592_v53, %v2452_v34  ;;  %v2575_v58 = vpop.f32.mrf.mxu0 }
 0x17d   : > { %v879_v57 = vpop.f32.mrf.mxu1  ;;  %v3611_v60 = vadd.f32 %v2575_v58, %v2443_v39 }
 0x17e   : > { %v3609_v59 = vadd.f32 %v2452_v34, %v879_v57  ;;  %v749_v63 = vpop.f32.mrf.mxu0 }
 0x17f   : > { %v2595_v62 = vpop.f32.mrf.mxu1  ;;  %v3617_v2 = vadd.f32 %v2443_v39, %v749_v63 }
 0x180   : > { %v895_v1 = vadd.f32 %v2595_v62, %v2452_v34  ;;  %v2602_v6 = vpop.f32.mrf.mxu0 }
 0x181   : > { %v889_v3 = vpop.f32.mrf.mxu1  ;;  %v1011_v9 = vadd.f32 %v2602_v6, %v725_v0  ;;  %v898_v0 = vld [vmem:[%s4231_s17] sm:$0xff] }
 0x182   : > { %v890_v8 = vadd.f32 %v2452_v34, %v889_v3  ;;  %v1001_v11 = vpop.f32.mrf.mxu0  ;;  %v899_v3 = vld [vmem:[%s4231_s17 + $0x8] sm:$0xff] }
 0x183   : > { %v2609_v10 = vpop.f32.mrf.mxu1  ;;  %v1096_v13 = vmul.f32 %v1011_v9, %v3621_v5  ;;  %v1010_v15 = vadd.f32 %v1001_v11, %v720_v7 }
 0x184   : > { %v1094_v14 = vadd.f32 %v2609_v10, %v895_v1 }
 0x185   : > { %v1084_v16 = vpop.f32.mrf.mxu1  ;;  %2823 = vtanh.f32 %v1096_v13  ;;  %v1095_v19 = vmul.f32 %v1010_v15, %v3621_v5 }
 0x186   : > { %v1104_v18 = vmul.f32 %v1094_v14, %v3621_v5  ;;  %v1093_v21 = vadd.f32 %v1084_v16, %v890_v8 }
 0x188   : > { %2825 = vtanh.f32 %v1104_v18  ;;  %v1103_v22 = vmul.f32 %v1093_v21, %v3621_v5 }
 0x189   : > { %2827 = vtanh.f32 %v1095_v19 }
 0x18a   : > { %2829 = vtanh.f32 %v1103_v22 }
 0x192   : > { %v2824_v24 = vpop.eup %2823 }
 0x193   : > { %v1100_v26 = vmul.f32 %v2824_v24, %v3621_v5 }
 0x195   : > { %v2826_v27 = vpop.eup %2825  ;;  %v3633_v33 = vadd.f32 %v1100_v26, %v3629_v25  ;;  %v3714_v26 = vstv %s1764_s13 }
 0x196   : > { %v2828_v29 = vpop.eup %2827  ;;  %v1108_v34 = vmul.f32 %v2826_v27, %v3621_v5 }
 0x197   : > { %v2830_v35 = vpop.eup %2829  ;;  %v1099_v36 = vmul.f32 %v2828_v29, %v3621_v5  ;;  %1125 = vrot.lane.b32.xlu1 %v3633_v33, %s3205_s0 }
 0x198   : > { %v1107_v40 = vmul.f32 %v2830_v35, %v3621_v5  ;;  %v3644_v41 = vadd.f32 %v1108_v34, %v3629_v25 }
 0x199   : > { %v3640_v39 = vadd.f32 %v1099_v36, %v3629_v25 }
 0x19a   : > { %v3651_v44 = vadd.f32 %v1107_v40, %v3629_v25 }
 0x19b   : > { %1123 = vrot.lane.b32.xlu0 %v3640_v39, %s3205_s0  ;;  %1167 = vrot.lane.b32.xlu1 %v3644_v41, %s3205_s0 }
 0x19f   : > { %1165 = vrot.lane.b32.xlu0 %v3651_v44, %s3205_s0  ;;  %1155 = vrot.lane.b32.xlu1 %v925_v45, %s3206_s1 }
 0x1a3   : > { %1113 = vrot.lane.b32.xlu0 %v921_v46, %s3206_s1  ;;  %1157 = vrot.lane.b32.xlu1 %v926_v49, %s3206_s1 }
 0x1a7   : > { %1115 = vrot.lane.b32.xlu0 %v922_v50, %s3206_s1  ;;  %v3734_v50 = vstv %s3706_s19 }
 0x209   : > { %v1126_v53 = vpop.permute.xlu1 %1125 }
 0x20a   : > { %v1130_v61 = vmul.f32 %v1126_v53, %v3633_v33 }
 0x20d   : > { %v1124_v54 = vpop.permute.xlu0 %1123  ;;  %v1168_v63 = vpop.permute.xlu1 %1167 }
 0x20e   : > { %v1129_v57 = vmul.f32 %v1124_v54, %v3640_v39  ;;  %v1172_v1 = vmul.f32 %v1168_v63, %v3644_v41 }
 0x210   : > { %1133 = vrot.lane.b32.xlu0 %v1129_v57, %s3206_s1 }
 0x211   : > { %v1166_v58 = vpop.permute.xlu0 %1165  ;;  %v3679_v6 = vpop.permute.xlu1 %1155 }
 0x212   : > { %v1171_v62 = vmul.f32 %v1166_v58, %v3651_v44  ;;  %v1161_v18 = vmul.f32 %v3679_v6, %v3651_v44 }
 0x214   : > { %1135 = vrot.lane.b32.xlu0 %v1130_v61, %s3206_s1  ;;  %1175 = vrot.lane.b32.xlu1 %v1171_v62, %s3206_s1 }
 0x215   : > { %v3677_v4 = vpop.permute.xlu0 %1113  ;;  %v3683_v8 = vpop.permute.xlu1 %1157 }
 0x218   : > { %901 = vperm.xlu0 %2821, %v898_v0   ;;  %1177 = vrot.lane.b32.xlu1 %v1172_v1, %s3206_s1 }
 0x219   : > { %v3681_v7 = vpop.permute.xlu0 %1115 }
 0x21a   : > { %v1120_v10 = vmul.f32 %v3681_v7, %v3633_v33 }
 0x21c   : > { %904 = vperm.xlu1 %2822, %v899_v3   ;;  %1210 = vrot.lane.b32.xlu0 %v3565_v30, %s3207_s8  ;;  %v1162_v30 = vmul.f32 %v3683_v8, %v3644_v41 }
 0x220   : > { %1200 = vrot.lane.b32.xlu1 %v3558_v28, %s3207_s8  ;;  %v1119_v28 = vmul.f32 %v3677_v4, %v3640_v39 }
 0x282   : > { %v1134_v9 = vpop.permute.xlu0 %1133 }
 0x283   : > { %v3693_v15 = vadd.f32 %v1134_v9, %v1119_v28 }
 0x286   : > { %v1176_v11 = vpop.permute.xlu1 %1175  ;;  %v1136_v13 = vpop.permute.xlu0 %1135 }
 0x287   : > { %v3687_v14 = vadd.f32 %v1136_v13, %v1120_v10  ;;  %v3700_v21 = vadd.f32 %v1176_v11, %v1161_v18 }
 0x289   : > { %2831 = vtanh.f32 %v3687_v14 }
 0x28a   : > { %v1178_v16 = vpop.permute.xlu1 %1177 }
 0x28b   : > { %v3698_v19 = vadd.f32 %v1178_v16, %v1162_v30 }
 0x28d   : > { %2833 = vtanh.f32 %v3698_v19 }
 0x28e   : > { %2835 = vtanh.f32 %v3693_v15 }
 0x28f   : > { %2837 = vtanh.f32 %v3700_v21 }
 0x293   : > { %v3709_v22 = vpop.permute.xlu0 %901 }
 0x294   : > { %v3712_v24 = vsub.s32 8, %v3709_v22  ;;  %vm1196_vm8 = vcmp.lt.s32.totalorder %v3734_v50, %v3709_v22 }
 0x296   : > { %vm2026_vm6 = vcmp.ge.s32.totalorder %v3714_v26, %v3712_v24  ;;  %v2832_v27 = vpop.eup %2831  ;;  %vm1198_vm9 = vcmp.ge.s32.totalorder %v3734_v50, %v3712_v24 }
 0x297   : > { %v3718_v29 = vpop.permute.xlu1 %904  ;;  %1147 = vrot.lane.b32.xlu1 %v2832_v27, %s3208_s15  ;;  %v1211_v45 = vpop.permute.xlu0 %1210 }
 0x298   : > { %v3721_v34 = vsub.s32 8, %v3718_v29  ;;  %vm1197_vm10 = vcmp.lt.s32.totalorder %v3734_v50, %v3718_v29  ;;  %vm2025_vm5 = vcmp.lt.s32.totalorder %v3714_v26, %v3718_v29 }
 0x29a   : > { %v2834_v35 = vpop.eup %2833  ;;  %vm2027_vm7 = vcmp.ge.s32.totalorder %v3714_v26, %v3721_v34  ;;  %vm1199_vm11 = vcmp.ge.s32.totalorder %v3734_v50, %v3721_v34 }
 0x29b   : > { %v2836_v36 = vpop.eup %2835  ;;  %1189 = vrot.lane.b32.xlu0 %v2834_v35, %s3208_s15  ;;  %v1201_v40 = vpop.permute.xlu1 %1200 }
 0x29c   : > { %1145 = vrot.lane.b32.xlu1 %v2836_v36, %s3208_s15  ;;  %v2838_v37 = vpop.eup %2837 }
 0x29f   : > { %1187 = vrot.lane.b32.xlu0 %v2838_v37, %s3208_s15 }
 0x2a0   : > { %1202 = vrot.lane.b32.xlu1 %v3569_v31, %s3207_s8 }
 0x2a3   : > { %1212 = vrot.lane.b32.xlu0 %v3574_v32, %s3207_s8 }
 0x309   : > { %v1148_v46 = vpop.permute.xlu1 %1147 }
 0x30a   : > { %v1152_v61 = vmul.f32 %v1148_v46, %v3633_v33 }
 0x30d   : > { %v1190_v49 = vpop.permute.xlu0 %1189 }
 0x30e   : > { %v1146_v53 = vpop.permute.xlu1 %1145 }
 0x30f   : > { %v1151_v54 = vmul.f32 %v1146_v53, %v3640_v39 }
 0x311   : > { %v3742_v57 = vsel %vm1196_vm8, %v1151_v54, %v1201_v40  ;;  %v1188_v31 = vpop.permute.xlu0 %1187 }
 0x312   : > { %v1203_v58 = vpop.permute.xlu1 %1202  ;;  %1223 = vrot.lane.b32.xlu1 %v3742_v57, %s3209_s14  ;;  %v1193_v32 = vmul.f32 %v1188_v31, %v3651_v44  ;;  %v1194_v44 = vmul.f32 %v1190_v49, %v3644_v41 }
 0x313   : > { %v3760_v62 = vsel %vm1197_vm10, %v1152_v61, %v1203_v58 }
 0x314   : > { %v3755_v39 = vsel %vm1198_vm9, %v1193_v32, %v1211_v45 }
 0x315   : > { %1310 = vrot.lane.b32.xlu0 %v3755_v39, %s3209_s14  ;;  %v1213_v33 = vpop.permute.xlu0 %1212 }
 0x316   : > { %1225 = vrot.lane.b32.xlu1 %v3760_v62, %s3209_s14  ;;  %v3772_v63 = vsel %vm1199_vm11, %v1194_v44, %v1213_v33 }
 0x319   : > { %1312 = vrot.lane.b32.xlu0 %v3772_v63, %s3209_s14 }
 0x384   : > { %v1224_v0 = vpop.permute.xlu1 %1223 }
 0x385   : > { %2614 = vmatprep.mubr.msk.f32.mxu0 %vm928_vm2, %v1224_v0 }
 0x387   : > { %v1311_v1 = vpop.permute.xlu0 %1310 }
 0x388   : > { %v1226_v3 = vpop.permute.xlu1 %1225  ;;  %2621 = vmatprep.mubr.msk.f32.mxu1 %vm928_vm2, %v1311_v1 }
 0x389   : > { %2615 = vmatmul.mubr.msk.f32.vlgmr.msra.gmra.mxu0 %vm928_vm2, %v1226_v3 }
 0x38a   : > { %2625 = vmatpush3.msra.mxu0 %v3515_v12 }
 0x38b   : > { %v1313_v41 = vpop.permute.xlu0 %1312  ;;  %2626 = vmatprep.subr.mxu0 %v3535_v20 }
 0x38c   : > { %2622 = vmatmul.mubr.msk.f32.vlgmr.msra.gmra.mxu1 %vm928_vm2, %v1313_v41  ;;  %2627 = vmatpush3.msra.mxu0 %v3535_v20 }
 0x38d   : > { %2632 = vmatpush3.msra.mxu1 %v3524_v17  ;;  %2638 = vmatprep.subr.mxu0 %v3515_v12 }
 0x38e   : > { %2633 = vmatprep.subr.mxu1 %v3543_v23 }
 0x38f   : > { %2634 = vmatpush3.msra.mxu1 %v3543_v23 }
 0x390   : > { %2645 = vmatprep.subr.mxu1 %v3524_v17 }
 0x449   : > { %v2616_v9 = vpop.f32.mrf.mxu0 }
 0x44a   : > { %v1307_v10 = vadd.f32 %v2616_v9, %v3595_v43  ;;  %v3817_v9 = vsel %vm1196_vm8, %v3693_v15, %v3677_v4  ;;  %vm2024_vm8 = vcmp.lt.s32.totalorder %v3714_v26, %v3709_v22 }
 0x44b   : > { %v1297_v11 = vpop.f32.mrf.mxu0 }
 0x44c   : > { %v1396_v13 = vmul.f32 %v1307_v10, %v3621_v5  ;;  %v1306_v28 = vadd.f32 %v1297_v11, %v3599_v48  ;;  %v2623_v30 = vpop.f32.mrf.mxu1 }
 0x44d   : > { %v1394_v16 = vadd.f32 %v2623_v30, %v3605_v55  ;;  %v3834_v30 = vsel %vm1197_vm10, %v3687_v14, %v3681_v7 }
 0x44e   : > { %v1395_v18 = vmul.f32 %v1306_v28, %v3621_v5  ;;  %v1384_v27 = vpop.f32.mrf.mxu1  ;;  %2839 = vtanh.f32 %v1396_v13  ;;  %v3827_v28 = vsel %vm1198_vm9, %v3700_v21, %v3679_v6  ;;  %v3848_v6 = vsel %vm1199_vm11, %v3698_v19, %v3683_v8 }
 0x44f   : > { %v1404_v35 = vmul.f32 %v1394_v16, %v3621_v5  ;;  %v1393_v36 = vadd.f32 %v1384_v27, %v3609_v59 }
 0x450   : > { %2841 = vtanh.f32 %v1395_v18 }
 0x451   : > { %v1403_v37 = vmul.f32 %v1393_v36, %v3621_v5  ;;  %2843 = vtanh.f32 %v1404_v35 }
 0x453   : > { %2845 = vtanh.f32 %v1403_v37 }
 0x45b   : > { %v2840_v43 = vpop.eup %2839 }
 0x45c   : > { %v1400_v49 = vmul.f32 %v2840_v43, %v3621_v5 }
 0x45d   : > { %v2842_v40 = vpop.eup %2841 }
 0x45e   : > { %v1399_v48 = vmul.f32 %v2842_v40, %v3621_v5  ;;  %v2844_v45 = vpop.eup %2843  ;;  %v1402_v31 = vadd.f32 %v1400_v49, %v3629_v25  ;;  %v3861_v40 = vstv %s1220_s3 }
 0x45f   : > { %v1408_v54 = vmul.f32 %v2844_v45, %v3621_v5  ;;  %vm1480_vm12 = vcmp.lt.s32.totalorder %v3861_v40, %v3709_v22  ;;  %vm1482_vm13 = vcmp.ge.s32.totalorder %v3861_v40, %v3712_v24  ;;  %vm1481_vm14 = vcmp.lt.s32.totalorder %v3861_v40, %v3718_v29 }
 0x460   : > { %v2846_v46 = vpop.eup %2845  ;;  %v1401_v55 = vadd.f32 %v1399_v48, %v3629_v25  ;;  %v1412_v15 = vmul.f32 %v1402_v31, %v3834_v30  ;;  %vm1483_vm15 = vcmp.ge.s32.totalorder %v3861_v40, %v3721_v34 }
 0x461   : > { %v1407_v53 = vmul.f32 %v2846_v46, %v3621_v5  ;;  %v1410_v58 = vadd.f32 %v1408_v54, %v3629_v25 }
 0x462   : > { %1415 = vrot.lane.b32.xlu1 %v1401_v55, %s3205_s0  ;;  %v1411_v10 = vmul.f32 %v1401_v55, %v3817_v9 }
 0x463   : > { %v1409_v59 = vadd.f32 %v1407_v53, %v3629_v25  ;;  %v1446_v7 = vmul.f32 %v1410_v58, %v3848_v6 }
 0x465   : > { %1449 = vrot.lane.b32.xlu0 %v1409_v59, %s3205_s0  ;;  %v1445_v4 = vmul.f32 %v1409_v59, %v3827_v28 }
 0x466   : > { %1417 = vrot.lane.b32.xlu1 %v1402_v31, %s3205_s0 }
 0x469   : > { %1451 = vrot.lane.b32.xlu0 %v1410_v58, %s3205_s0 }
 0x4d4   : > { %v1416_v32 = vpop.permute.xlu1 %1415 }
 0x4d5   : > { %v1421_v61 = vmul.f32 %v1416_v32, %v1401_v55 }
 0x4d7   : > { %1425 = vrot.lane.b32.xlu1 %v1421_v61, %s3206_s1  ;;  %v1450_v33 = vpop.permute.xlu0 %1449 }
 0x4d8   : > { %v1418_v44 = vpop.permute.xlu1 %1417  ;;  %v1455_v0 = vmul.f32 %v1450_v33, %v1409_v59 }
 0x4d9   : > { %v1422_v1 = vmul.f32 %v1418_v44, %v1402_v31 }
 0x4da   : > { %1459 = vrot.lane.b32.xlu0 %v1455_v0, %s3206_s1 }
 0x4db   : > { %1427 = vrot.lane.b32.xlu1 %v1422_v1, %s3206_s1  ;;  %v1452_v3 = vpop.permute.xlu0 %1451 }
 0x4dc   : > { %v1456_v41 = vmul.f32 %v1452_v3, %v1410_v58 }
 0x4de   : > { %1461 = vrot.lane.b32.xlu0 %v1456_v41, %s3206_s1 }
 0x549   : > { %v1426_v11 = vpop.permute.xlu1 %1425 }
 0x54a   : > { %v3820_v13 = vadd.f32 %v1426_v11, %v1411_v10 }
 0x54c   : > { %2847 = vtanh.f32 %v3820_v13  ;;  %v1460_v16 = vpop.permute.xlu0 %1459 }
 0x54d   : > { %v1428_v18 = vpop.permute.xlu1 %1427  ;;  %v3839_v27 = vadd.f32 %v1460_v16, %v1445_v4 }
 0x54e   : > { %v3841_v35 = vadd.f32 %v1428_v18, %v1412_v15 }
 0x54f   : > { %2849 = vtanh.f32 %v3839_v27 }
 0x550   : > { %2851 = vtanh.f32 %v3841_v35  ;;  %v1462_v14 = vpop.permute.xlu0 %1461 }
 0x551   : > { %v3853_v21 = vadd.f32 %v1462_v14, %v1446_v7 }
 0x553   : > { %2853 = vtanh.f32 %v3853_v21 }
 0x559   : > { %v2848_v36 = vpop.eup %2847 }
 0x55a   : > { %1437 = vrot.lane.b32.xlu1 %v2848_v36, %s3208_s15 }
 0x55c   : > { %v2850_v37 = vpop.eup %2849 }
 0x55d   : > { %v2852_v43 = vpop.eup %2851  ;;  %1471 = vrot.lane.b32.xlu0 %v2850_v37, %s3208_s15 }
 0x55e   : > { %1439 = vrot.lane.b32.xlu1 %v2852_v43, %s3208_s15 }
 0x560   : > { %v2854_v8 = vpop.eup %2853 }
 0x561   : > { %1473 = vrot.lane.b32.xlu0 %v2854_v8, %s3208_s15 }
 0x5cc   : > { %v1438_v19 = vpop.permute.xlu1 %1437 }
 0x5cd   : > { %v1443_v50 = vmul.f32 %v1438_v19, %v1401_v55 }
 0x5cf   : > { %v3869_v48 = vsel %vm1480_vm12, %v1443_v50, %v3742_v57  ;;  %v1472_v45 = vpop.permute.xlu0 %1471 }
 0x5d0   : > { %1495 = vrot.lane.b32.xlu1 %v3869_v48, %s3209_s14  ;;  %v1440_v46 = vpop.permute.xlu1 %1439  ;;  %v1477_v49 = vmul.f32 %v1472_v45, %v1409_v59 }
 0x5d1   : > { %v1444_v53 = vmul.f32 %v1440_v46, %v1402_v31 }
 0x5d2   : > { %v3881_v55 = vsel %vm1482_vm13, %v1477_v49, %v3755_v39  ;;  %v3942_v49 = vsel %vm1480_vm12, %v3820_v13, %v3817_v9 }
 0x5d3   : > { %v3887_v57 = vsel %vm1481_vm14, %v1444_v53, %v3760_v62  ;;  %1582 = vrot.lane.b32.xlu0 %v3881_v55, %s3209_s14  ;;  %v1474_v59 = vpop.permute.xlu0 %1473 }
 0x5d4   : > { %1497 = vrot.lane.b32.xlu1 %v3887_v57, %s3209_s14  ;;  %v1478_v54 = vmul.f32 %v1474_v59, %v1410_v58 }
 0x5d6   : > { %v3899_v39 = vsel %vm1483_vm15, %v1478_v54, %v3772_v63 }
 0x5d7   : > { %1584 = vrot.lane.b32.xlu0 %v3899_v39, %s3209_s14 }
 0x642   : > { %v1496_v62 = vpop.permute.xlu1 %1495 }
 0x643   : > { %2628 = vmatprep.mubr.msk.f32.mxu0 %vm928_vm2, %v1496_v62  ;;  %v3952_v62 = vsel %vm1482_vm13, %v3839_v27, %v3827_v28  ;;  %v3973_v28 = vsel %vm1483_vm15, %v3853_v21, %v3848_v6 }
 0x645   : > { %v1583_v31 = vpop.permute.xlu0 %1582 }
 0x646   : > { %v1498_v32 = vpop.permute.xlu1 %1497  ;;  %2635 = vmatprep.mubr.msk.f32.mxu1 %vm928_vm2, %v1583_v31  ;;  %v3959_v31 = vsel %vm1481_vm14, %v3841_v35, %v3834_v30 }
 0x647   : > { %2629 = vmatmul.mubr.msk.f32.vlgmr.msra.gmra.mxu0 %vm928_vm2, %v1498_v32 }
 0x648   : > { %2639 = vmatpush3.msra.mxu0 %v3515_v12 }
 0x649   : > { %v1585_v58 = vpop.permute.xlu0 %1584  ;;  %2640 = vmatprep.subr.mxu0 %v3535_v20 }
 0x64a   : > { %2636 = vmatmul.mubr.msk.f32.vlgmr.msra.gmra.mxu1 %vm928_vm2, %v1585_v58  ;;  %2641 = vmatpush3.msra.mxu0 %v3535_v20 }
 0x64b   : > { %2646 = vmatpush3.msra.mxu1 %v3524_v17 }
 0x64c   : > { %2647 = vmatprep.subr.mxu1 %v3543_v23 }
 0x64d   : > { %2648 = vmatpush3.msra.mxu1 %v3543_v23 }
 0x707   : > { %v2630_v63 = vpop.f32.mrf.mxu0 }
 0x708   : > { %v1579_v61 = vadd.f32 %v2630_v63, %v3603_v52 }
 0x709   : > { %v1569_v33 = vpop.f32.mrf.mxu0 }
 0x70a   : > { %v1668_v44 = vmul.f32 %v1579_v61, %v3621_v5  ;;  %v1578_v12 = vadd.f32 %v1569_v33, %v3607_v56  ;;  %v2637_v0 = vpop.f32.mrf.mxu1 }
 0x70b   : > { %v1666_v1 = vadd.f32 %v2637_v0, %v3597_v47  ;;  %v3986_v0 = vstv %s1492_s9 }
 0x70c   : > { %v1667_v3 = vmul.f32 %v1578_v12, %v3621_v5  ;;  %v1656_v20 = vpop.f32.mrf.mxu1  ;;  %2855 = vtanh.f32 %v1668_v44  ;;  %vm1752_vm0 = vcmp.lt.s32.totalorder %v3986_v0, %v3709_v22  ;;  %vm1754_vm1 = vcmp.ge.s32.totalorder %v3986_v0, %v3712_v24 }
 0x70d   : > { %v1676_v17 = vmul.f32 %v1666_v1, %v3621_v5  ;;  %v1665_v41 = vadd.f32 %v1656_v20, %v3601_v51  ;;  %vm1753_vm3 = vcmp.lt.s32.totalorder %v3986_v0, %v3718_v29  ;;  %vm1755_vm4 = vcmp.ge.s32.totalorder %v3986_v0, %v3721_v34 }
 0x70e   : > { %2857 = vtanh.f32 %v1667_v3 }
 0x70f   : > { %v1675_v23 = vmul.f32 %v1665_v41, %v3621_v5  ;;  %2859 = vtanh.f32 %v1676_v17 }
 0x711   : > { %2861 = vtanh.f32 %v1675_v23 }
 0x719   : > { %v2856_v52 = vpop.eup %2855 }
 0x71a   : > { %v1672_v15 = vmul.f32 %v2856_v52, %v3621_v5 }
 0x71b   : > { %v2858_v10 = vpop.eup %2857 }
 0x71c   : > { %v1671_v56 = vmul.f32 %v2858_v10, %v3621_v5  ;;  %v2860_v11 = vpop.eup %2859  ;;  %v1674_v7 = vadd.f32 %v1672_v15, %v3629_v25 }
 0x71d   : > { %v1680_v18 = vmul.f32 %v2860_v11, %v3621_v5 }
 0x71e   : > { %v2862_v4 = vpop.eup %2861  ;;  %v1673_v47 = vadd.f32 %v1671_v56, %v3629_v25  ;;  %v1684_v13 = vmul.f32 %v1674_v7, %v3959_v31 }
 0x71f   : > { %v1679_v16 = vmul.f32 %v2862_v4, %v3621_v5  ;;  %v1682_v14 = vadd.f32 %v1680_v18, %v3629_v25 }
 0x720   : > { %1687 = vrot.lane.b32.xlu1 %v1673_v47, %s3205_s0  ;;  %v1683_v53 = vmul.f32 %v1673_v47, %v3942_v49 }
 0x721   : > { %v1681_v51 = vadd.f32 %v1679_v16, %v3629_v25  ;;  %v1718_v30 = vmul.f32 %v1682_v14, %v3973_v28 }
 0x723   : > { %1721 = vrot.lane.b32.xlu0 %v1681_v51, %s3205_s0  ;;  %v1717_v9 = vmul.f32 %v1681_v51, %v3952_v62 }
 0x724   : > { %1689 = vrot.lane.b32.xlu1 %v1674_v7, %s3205_s0 }
 0x727   : > { %1723 = vrot.lane.b32.xlu0 %v1682_v14, %s3205_s0 }
 0x792   : > { %v1688_v36 = vpop.permute.xlu1 %1687 }
 0x793   : > { %v1693_v37 = vmul.f32 %v1688_v36, %v1673_v47 }
 0x795   : > { %1697 = vrot.lane.b32.xlu1 %v1693_v37, %s3206_s1  ;;  %v1722_v43 = vpop.permute.xlu0 %1721 }
 0x796   : > { %v1690_v8 = vpop.permute.xlu1 %1689  ;;  %v1727_v19 = vmul.f32 %v1722_v43, %v1681_v51 }
 0x797   : > { %v1694_v50 = vmul.f32 %v1690_v8, %v1674_v7 }
 0x798   : > { %1731 = vrot.lane.b32.xlu0 %v1727_v19, %s3206_s1 }
 0x799   : > { %1699 = vrot.lane.b32.xlu1 %v1694_v50, %s3206_s1  ;;  %v1724_v45 = vpop.permute.xlu0 %1723 }
 0x79a   : > { %v1728_v46 = vmul.f32 %v1724_v45, %v1682_v14 }
 0x79c   : > { %1733 = vrot.lane.b32.xlu0 %v1728_v46, %s3206_s1 }
 0x807   : > { %v1698_v59 = vpop.permute.xlu1 %1697 }
 0x808   : > { %v3945_v54 = vadd.f32 %v1698_v59, %v1683_v53 }
 0x80a   : > { %2863 = vtanh.f32 %v3945_v54  ;;  %v1732_v32 = vpop.permute.xlu0 %1731 }
 0x80b   : > { %v1700_v58 = vpop.permute.xlu1 %1699  ;;  %v3964_v63 = vadd.f32 %v1732_v32, %v1717_v9 }
 0x80c   : > { %v3966_v61 = vadd.f32 %v1700_v58, %v1684_v13 }
 0x80d   : > { %2865 = vtanh.f32 %v3964_v63 }
 0x80e   : > { %2867 = vtanh.f32 %v3966_v61  ;;  %v1734_v27 = vpop.permute.xlu0 %1733 }
 0x80f   : > { %v3978_v35 = vadd.f32 %v1734_v27, %v1718_v30 }
 0x811   : > { %2869 = vtanh.f32 %v3978_v35 }
 0x817   : > { %v2864_v33 = vpop.eup %2863 }
 0x818   : > { %1709 = vrot.lane.b32.xlu1 %v2864_v33, %s3208_s15 }
 0x81a   : > { %v2866_v44 = vpop.eup %2865 }
 0x81b   : > { %v2868_v12 = vpop.eup %2867  ;;  %1743 = vrot.lane.b32.xlu0 %v2866_v44, %s3208_s15 }
 0x81c   : > { %1711 = vrot.lane.b32.xlu1 %v2868_v12, %s3208_s15 }
 0x81e   : > { %v2870_v6 = vpop.eup %2869 }
 0x81f   : > { %1745 = vrot.lane.b32.xlu0 %v2870_v6, %s3208_s15 }
 0x88a   : > { %v1710_v21 = vpop.permute.xlu1 %1709 }
 0x88b   : > { %v1715_v40 = vmul.f32 %v1710_v21, %v1673_v47 }
 0x88d   : > { %v3994_v1 = vsel %vm1752_vm0, %v1715_v40, %v3869_v48  ;;  %v1744_v3 = vpop.permute.xlu0 %1743  ;;  %v1758_v40 = vsel %vm1752_vm0, %v3945_v54, %v3942_v49 }
 0x88e   : > { %1767 = vrot.lane.b32.xlu1 %v3994_v1, %s3209_s14  ;;  %v1712_v20 = vpop.permute.xlu1 %1711  ;;  %v1749_v17 = vmul.f32 %v1744_v3, %v1681_v51 }
 0x88f   : > { %v1716_v41 = vmul.f32 %v1712_v20, %v1674_v7 }
 0x890   : > { %v4006_v23 = vsel %vm1754_vm1, %v1749_v17, %v3881_v55 }
 0x891   : > { %v4012_v48 = vsel %vm1753_vm3, %v1716_v41, %v3887_v57  ;;  %1854 = vrot.lane.b32.xlu0 %v4006_v23, %s3209_s14  ;;  %v1746_v52 = vpop.permute.xlu0 %1745  ;;  %v1763_v41 = vsel %vm1755_vm4, %v3978_v35, %v3973_v28 }
 0x892   : > { %1769 = vrot.lane.b32.xlu1 %v4012_v48, %s3209_s14  ;;  %v1750_v10 = vmul.f32 %v1746_v52, %v1682_v14 }
 0x894   : > { %v4024_v55 = vsel %vm1755_vm4, %v1750_v10, %v3899_v39  ;;  %v1762_v10 = vsel %vm1754_vm1, %v3964_v63, %v3952_v62 }
 0x895   : > { %1856 = vrot.lane.b32.xlu0 %v4024_v55, %s3209_s14 }
 0x900   : > { %v1768_v57 = vpop.permute.xlu1 %1767 }
 0x901   : > { %2642 = vmatprep.mubr.msk.f32.mxu0 %vm928_vm2, %v1768_v57 }
 0x903   : > { %v1855_v56 = vpop.permute.xlu0 %1854 }
 0x904   : > { %v1770_v11 = vpop.permute.xlu1 %1769  ;;  %2649 = vmatprep.mubr.msk.f32.mxu1 %vm928_vm2, %v1855_v56 }
 0x905   : > { %2643 = vmatmul.mubr.msk.f32.vlgmr.msra.gmra.mxu0 %vm928_vm2, %v1770_v11 }
 0x907   : > { %v1857_v4 = vpop.permute.xlu0 %1856 }
 0x908   : > { %2650 = vmatmul.mubr.msk.f32.vlgmr.msra.gmra.mxu1 %vm928_vm2, %v1857_v4 }
 0x9c5   : > { %v2644_v47 = vpop.f32.mrf.mxu0 }
 0x9c6   : > { %v1851_v15 = vadd.f32 %v2644_v47, %v3611_v60 }
 0x9c7   : > { %v1841_v39 = vpop.f32.mrf.mxu0 }
 0x9c8   : > { %v1940_v16 = vmul.f32 %v1851_v15, %v3621_v5  ;;  %v1850_v51 = vadd.f32 %v1841_v39, %v3617_v2  ;;  %v2651_v18 = vpop.f32.mrf.mxu1 }
 0x9c9   : > { %v1938_v7 = vadd.f32 %v2651_v18, %v3588_v38 }
 0x9ca   : > { %2871 = vtanh.f32 %v1940_v16  ;;  %v1939_v14 = vmul.f32 %v1850_v51, %v3621_v5  ;;  %v1928_v36 = vpop.f32.mrf.mxu1 }
 0x9cb   : > { %v1948_v37 = vmul.f32 %v1938_v7, %v3621_v5  ;;  %v1937_v43 = vadd.f32 %v1928_v36, %v3593_v42 }
 0x9cc   : > { %2873 = vtanh.f32 %v1939_v14 }
 0x9cd   : > { %2875 = vtanh.f32 %v1948_v37  ;;  %v1947_v60 = vmul.f32 %v1937_v43, %v3621_v5 }
 0x9cf   : > { %2877 = vtanh.f32 %v1947_v60 }
 0x9d7   : > { %v2872_v8 = vpop.eup %2871 }
 0x9d8   : > { %v1944_v19 = vmul.f32 %v2872_v8, %v3621_v5 }
 0x9d9   : > { %v2874_v2 = vpop.eup %2873 }
 0x9da   : > { %v2876_v50 = vpop.eup %2875  ;;  %v1946_v38 = vadd.f32 %v1944_v19, %v3629_v25  ;;  %v1943_v45 = vmul.f32 %v2874_v2, %v3621_v5 }
 0x9db   : > { %v1952_v46 = vmul.f32 %v2876_v50, %v3621_v5 }
 0x9dc   : > { %v2878_v53 = vpop.eup %2877  ;;  %1961 = vrot.lane.b32.xlu0 %v1946_v38, %s3205_s0  ;;  %v1945_v42 = vadd.f32 %v1943_v45, %v3629_v25 }
 0x9dd   : > { %v1954_v59 = vadd.f32 %v1952_v46, %v3629_v25  ;;  %v1951_v9 = vmul.f32 %v2878_v53, %v3621_v5 }
 0x9de   : > { %1959 = vrot.lane.b32.xlu1 %v1945_v42, %s3205_s0  ;;  %v1955_v20 = vmul.f32 %v1945_v42, %v1758_v40 }
 0x9df   : > { %v4050_v13 = vadd.f32 %v1951_v9, %v3629_v25  ;;  %v1759_v25 = vsel %vm1753_vm3, %v3966_v61, %v3959_v31  ;;  %v1990_v31 = vmul.f32 %v1954_v59, %v1763_v41 }
 0x9e0   : > { %1995 = vrot.lane.b32.xlu0 %v1954_v59, %s3205_s0  ;;  %v1956_v6 = vmul.f32 %v1946_v38, %v1759_v25 }
 0x9e1   : > { %v1989_v54 = vmul.f32 %v4050_v13, %v1762_v10 }
 0x9e2   : > { %1993 = vrot.lane.b32.xlu1 %v4050_v13, %s3205_s0 }
 0xa4e   : > { %v1962_v32 = vpop.permute.xlu0 %1961 }
 0xa4f   : > { %v1966_v58 = vmul.f32 %v1962_v32, %v1946_v38 }
 0xa50   : > { %v1960_v30 = vpop.permute.xlu1 %1959 }
 0xa51   : > { %v1965_v27 = vmul.f32 %v1960_v30, %v1945_v42  ;;  %1971 = vrot.lane.b32.xlu0 %v1966_v58, %s3206_s1 }
 0xa52   : > { %v1996_v33 = vpop.permute.xlu0 %1995 }
 0xa53   : > { %v2000_v44 = vmul.f32 %v1996_v33, %v1954_v59  ;;  %1969 = vrot.lane.b32.xlu1 %v1965_v27, %s3206_s1 }
 0xa54   : > { %v1994_v5 = vpop.permute.xlu1 %1993 }
 0xa55   : > { %v1999_v12 = vmul.f32 %v1994_v5, %v4050_v13  ;;  %2005 = vrot.lane.b32.xlu0 %v2000_v44, %s3206_s1 }
 0xa57   : > { %2003 = vrot.lane.b32.xlu1 %v1999_v12, %s3206_s1 }
 0xac3   : > { %v1972_v21 = vpop.permute.xlu0 %1971 }
 0xac4   : > { %v1976_v3 = vadd.f32 %v1972_v21, %v1956_v6 }
 0xac5   : > { %v1970_v17 = vpop.permute.xlu1 %1969 }
 0xac6   : > { %2879 = vtanh.f32 %v1976_v3  ;;  %v1975_v52 = vadd.f32 %v1970_v17, %v1955_v20  ;;  %v2031_v4 = vsel %vm2025_vm5, %v1976_v3, %v1759_v25 }
 0xac7   : > { %v2006_v61 = vpop.permute.xlu0 %2005 }
 0xac8   : > { %2881 = vtanh.f32 %v1975_v52  ;;  %v2010_v49 = vadd.f32 %v2006_v61, %v1990_v31  ;;  %v2030_v47 = vsel %vm2024_vm8, %v1975_v52, %v1758_v40 }
 0xac9   : > { %v2004_v57 = vpop.permute.xlu1 %2003 }
 0xaca   : > { %2883 = vtanh.f32 %v2010_v49  ;;  %v2009_v56 = vadd.f32 %v2004_v57, %v1989_v54  ;;  %v2035_v28 = vsel %vm2027_vm7, %v2010_v49, %v1763_v41 }
 0xacc   : > { %2885 = vtanh.f32 %v2009_v56  ;;  %v2034_v35 = vsel %vm2026_vm6, %v2009_v56, %v1762_v10 }
 0xad3   : > { %v2880_v11 = vpop.eup %2879 }
 0xad4   : > { %1983 = vrot.lane.b32.xlu0 %v2880_v11, %s3208_s15 }
 0xad5   : > { %v2882_v62 = vpop.eup %2881 }
 0xad6   : > { %1981 = vrot.lane.b32.xlu1 %v2882_v62, %s3208_s15 }
 0xad7   : > { %v2884_v63 = vpop.eup %2883 }
 0xad8   : > { %2017 = vrot.lane.b32.xlu0 %v2884_v63, %s3208_s15 }
 0xad9   : > { %v2886_v0 = vpop.eup %2885 }
 0xada   : > { %2015 = vrot.lane.b32.xlu1 %v2886_v0, %s3208_s15 }
 0xadc   : > { %2050 = vrot.lane.b32.xlu0 %v2031_v4, %s3210_s5 }
 0xade   : > { %2048 = vrot.lane.b32.xlu1 %v2030_v47, %s3210_s5 }
 0xb46   : > { %v1984_v15 = vpop.permute.xlu0 %1983 }
 0xb47   : > { %v1988_v39 = vmul.f32 %v1984_v15, %v1946_v38 }
 0xb48   : > { %v1982_v16 = vpop.permute.xlu1 %1981 }
 0xb49   : > { %v1987_v51 = vmul.f32 %v1982_v16, %v1945_v42  ;;  %v2029_v18 = vsel %vm2025_vm5, %v1988_v39, %v4012_v48 }
 0xb4a   : > { %2040 = vrot.lane.b32.xlu0 %v2029_v18, %s3209_s14  ;;  %v2018_v7 = vpop.permute.xlu0 %2017 }
 0xb4b   : > { %v2022_v14 = vmul.f32 %v2018_v7, %v1954_v59  ;;  %v2028_v29 = vsel %vm2024_vm8, %v1987_v51, %v3994_v1 }
 0xb4c   : > { %2038 = vrot.lane.b32.xlu1 %v2028_v29, %s3209_s14  ;;  %v2016_v36 = vpop.permute.xlu1 %2015 }
 0xb4d   : > { %v2021_v37 = vmul.f32 %v2016_v36, %v4050_v13  ;;  %v2033_v22 = vsel %vm2027_vm7, %v2022_v14, %v4024_v55 }
 0xb4e   : > { %2060 = vrot.lane.b32.xlu0 %v2033_v22, %s3209_s14  ;;  %v2051_v43 = vpop.permute.xlu0 %2050 }
 0xb4f   : > { %2055 = vst.msk [vmem:[#allocation3 + $0x8] sm:$0xff] %vm928_vm2, %v2051_v43  ;;  %v2032_v1 = vsel %vm2026_vm6, %v2021_v37, %v4006_v23 }
 0xb50   : > { %2058 = vrot.lane.b32.xlu1 %v2032_v1, %s3209_s14  ;;  %v2049_v48 = vpop.permute.xlu1 %2048 }
 0xb51   : > { %2054 = vst.msk [vmem:[#allocation3] sm:$0xff] %vm928_vm2, %v2049_v48 }
 0xb52   : > { %2070 = vrot.lane.b32.xlu0 %v2035_v28, %s3210_s5 }
 0xb54   : > { %2068 = vrot.lane.b32.xlu1 %v2034_v35, %s3210_s5 }
 0xbbc   : > { %v2041_v60 = vpop.permute.xlu0 %2040 }
 0xbbd   : > { %2045 = vst.msk [vmem:[#allocation2 + $0x8] sm:$0xff] %vm928_vm2, %v2041_v60 }
 0xbbe   : > { %v2039_v34 = vpop.permute.xlu1 %2038 }
 0xbbf   : > { %2044 = vst.msk [vmem:[#allocation2] sm:$0xff] %vm928_vm2, %v2039_v34 }
 0xbc0   : > { %v2061_v55 = vpop.permute.xlu0 %2060 }
 0xbc1   : > { %2065 = vst.msk [vmem:[#allocation4 + $0x8] sm:$0xff] %vm928_vm2, %v2061_v55 }
 0xbc2   : > { %v2059_v8 = vpop.permute.xlu1 %2058 }
 0xbc3   : > { %2064 = vst.msk [vmem:[#allocation4] sm:$0xff] %vm928_vm2, %v2059_v8  ;;  %2079 = sbr.rel (%p2478_p3) target bundleno = 3221 (0xc95), region = 104 }
 0xbc4   : > { %v2071_v24 = vpop.permute.xlu0 %2070 }
 0xbc5   : > { %2075 = vst.msk [vmem:[#allocation5 + $0x8] sm:$0xff] %vm928_vm2, %v2071_v24 }
 0xbc6   : > { %v2069_v26 = vpop.permute.xlu1 %2068 }
 0xbc7   : > { %2074 = vst.msk [vmem:[#allocation5] sm:$0xff] %vm928_vm2, %v2069_v26 }
 0xbc8   : > { %v2083_v23 = vld [vmem:[#allocation17 + $0x8] sm:$0xff]  ;;  %v2081_v19 = vld [vmem:[%s4232_s6 + $0x8] sm:$0xff]  ;;  %v2082_v2 = vld [vmem:[#allocation17] sm:$0xff]  ;;  %2656 = vmatprep.mubr.msk.f32.mxu0 %vm928_vm2, %v2059_v8  ;;  %2663 = vmatprep.mubr.msk.f32.mxu1 %vm928_vm2, %v2039_v34 }
 0xbc9   : > { %2652 = vmatprep.subr.mxu0 %v2083_v23  ;;  %2659 = vmatprep.subr.mxu1 %v2081_v19  ;;  %v2080_v50 = vld [vmem:[%s4232_s6] sm:$0xff] }
 0xbca   : > { %2653 = vmatpush3.msra.mxu0 %v2083_v23  ;;  %2660 = vmatpush3.msra.mxu1 %v2081_v19  ;;  %v2483_v46 = vld [vmem:[%s4233_s4] ss:$0 sm:$0xff] }
 0xbcb   : > { %2654 = vmatprep.subr.mxu0 %v2082_v2  ;;  %2661 = vmatprep.subr.mxu1 %v2080_v50 }
 0xbcc   : > { %2655 = vmatpush3.msra.mxu0 %v2082_v2  ;;  %2662 = vmatpush3.msra.mxu1 %v2080_v50 }
 0xbcd   : > { %2657 = vmatmul.mubr.msk.f32.vlgmr.msra.gmra.mxu0 %vm928_vm2, %v2061_v55  ;;  %2664 = vmatmul.mubr.msk.f32.vlgmr.msra.gmra.mxu1 %vm928_vm2, %v2041_v60 }
 0xc8d   : > { %v2658_v38 = vpop.f32.mrf.mxu0  ;;  %v2665_v45 = vpop.f32.mrf.mxu1 }
 0xc8e   : > { %v2239_v53 = vadd.f32 %v2665_v45, %v2658_v38 }
 0xc8f   : > { %v2154_v42 = vpop.f32.mrf.mxu0  ;;  %v2233_v59 = vpop.f32.mrf.mxu1 }
 0xc90   : > { %v2250_v9 = vadd.f32 %v2483_v46, %v2239_v53  ;;  %v2234_v13 = vadd.f32 %v2233_v59, %v2154_v42 }
 0xc92   : > { %2252 = vst [vmem:[#allocation18 + $0x8] sm:$0xff] %v2250_v9  ;;  %v2249_v32 = vadd.f32 %v2483_v46, %v2234_v13 }
 0xc94   : > { %2251 = vst [vmem:[#allocation18] sm:$0xff] %v2249_v32 }
 0xc95 PF: > { %p2728_p11 = scmp.eq.s32.totalorder %s3325_s30, 1  ;;  %s3211_s18 = smov [#allocation18]  }
 0xc96   : > { %s2262_s10 = sshll.u32 %s3211_s18, 4  ;;  %s2263_s10 = int_to_ptr.vmem [resolvable:$true] %s2262_s10 }
 0xc97   : > { %s3073_s8 = scalar_lea.vmem %s2263_s10, 256  ;;  %p3080_p12 = scmp.lt.s32.totalorder %s2263_s10, %s2263_s10 }
 0xc98   : > { %p3074_p10 = scmp.ne.s32.totalorder %s2263_s10, %s3073_s8  ;;  %p3081_p4 = scmp.lt.s32.totalorder %s3073_s8, %s3073_s8 }
 0xc9a   : > { %p3075_p13 = pnand %p3074_p10, %p2728_p11  ;;  %p3082_p7 = por %p3081_p4, %p3080_p12 }
 0xc9c   : > { %p3076_p5 = pneg %p3075_p13 }
 0xc9e   : > { %p3083_p8 = pnand %p3082_p7, %p3076_p5 }
 0xca0   : > { %3086 = shalt.err (!%p3083_p8)
}
 0xca1   : > { %s3212_s19 = smov 128   ;;  %s3213_s13 = smov 8  }
 0xca2   : > { %s4234_s3 = sld [smem:[#allocation35_spill]] }
 0xca8   : > { %2691 = dma.vmem_to_hbm [thread:$0]  (%p2728_p11), %s2263_s10, 256, %s4234_s3, [#allocation8], %s3212_s19, %s3212_s19, %s3213_s13  }
 0xca9   : > { %3154 = dma.done.wait (%p2728_p11), [#allocation8], 256  }
 0xcaa   : > { %3156 = vsyncadd (%p2728_p11), [#allocation8], 4294967040 }
 0xcab PF: > { %s31_s29 = sadd.s32 1, %s3191_s29   ;;  %s4235_s21 = smov %s3163_s22 }
 0xcac   : > { %p28_p0 = scmp.ge.s32.totalorder %s31_s29, 4   ;;  %s4236_s22 = smov %s3167_s23 }
 0xcad   : > { %s4237_s23 = smov %s3451_s16  ;;  %s4238_s24 = smov %s3175_s25 }
 0xcae   : > { %s4239_s25 = smov %s3179_s26  ;;  %s4240_s26 = smov %s3422_s20 }
 0xcaf   : > { %s4241_s27 = smov %s3187_s28  ;;  %s4242_s28 = smov %s4244_s12 }
 0xcb0   :  { %30 = sbr.rel (!%p28_p0) target bundleno = 23 (0x17), region = 150 }
 0xcb5   :  { %2278 = vsyncpa [#allocation7], 1 }
 0xcb6   :  { %2280 = vsyncpa [#allocation7 + $0x1], 1 }
 0xcb7   :  { %2281 = vsyncpa [#allocation10], 1 }
 0xcb8   :  { %2283 = vsyncpa [#allocation10 + $0x1], 1 }
 0xcb9   :  { %2284 = vsyncpa [#allocation13], 1 }
 0xcba   :  { %2285 = vsyncpa [#allocation16], 1 }
 0xcbb   :  { %2286 = vsyncpa [#allocation8], 1 }
 0xcbc   :  { %2288 = vsyncpa [#allocation8 + $0x1], 1 }

</bundles_post_ra>
